<compile_context>
chip_gen: v7x
topology: tpu7x:2x2x1
jax: 0.10.0
libtpu: 0.0.40
codegen_flags: <defaults>
</compile_context>

<pallas_src>
import math
import functools

import jax
import jax.numpy as jnp
import numpy as np
from jax.experimental import pallas as pl
from jax.experimental.pallas import tpu as pltpu

# ----------------------------- model config ---------------------------------
SEQ = 8          # sequence length
BATCH = 2        # batch size
D_MODEL = 32     # embedding dim
NHEAD = 4        # number of attention heads
DIM_FF = 64      # feed-forward hidden dim
NUM_LAYERS = 2   # encoder layers
LN_EPS = 1e-5    # nn.LayerNorm default eps


def _layer_norm(x, w, b, eps):
    # PyTorch LayerNorm: biased variance over the last dim.
    mu = jnp.mean(x, axis=-1, keepdims=True)
    xc = x - mu
    var = jnp.mean(xc * xc, axis=-1, keepdims=True)
    inv = jax.lax.rsqrt(var + eps)
    return xc * inv * w + b


# ------------------------------ fused kernel ---------------------------------
def fused_encoder_kernel(
    x_ref,                      # (B*S, D)   flattened activations
    wq_ref, wk_ref, wv_ref,     # (L, D, D)  pre-transposed Wq^T / Wk^T / Wv^T
    bq_ref, bk_ref, bv_ref,     # (L, 1, D)
    wo_ref, bo_ref,             # (L, D, D)  out_proj.weight^T ; (L, 1, D)
    n1w_ref, n1b_ref,           # (L, 1, D)
    n2w_ref, n2b_ref,           # (L, 1, D)
    w1_ref, b1_ref,             # (L, D, F)  linear1.weight^T ; (L, 1, F)
    w2_ref, b2_ref,             # (L, F, D)  linear2.weight^T ; (L, 1, D)
    out_ref,                    # (B*S, D)
    *, num_layers, num_heads, batch, seq, eps,
):
    x = x_ref[...].astype(jnp.float32)          # (N, D), N = B*S
    d_model = x.shape[-1]
    d_head = d_model // num_heads
    scale = 1.0 / math.sqrt(d_head)

    def split_heads(t):
        # (B*S, D) -> (B*H, S, dh) using 8-aligned row/lane slices + stack.
        parts = []
        for b in range(batch):
            rows = t[b * seq:(b + 1) * seq, :]                     # (S, D)
            for h in range(num_heads):
                parts.append(rows[:, h * d_head:(h + 1) * d_head])  # (S, dh)
        return jnp.stack(parts, axis=0)                            # (B*H, S, dh)

    def merge_heads(t):
        # (B*H, S, dh) -> (B*S, D)
        rows = []
        for b in range(batch):
            rows.append(jnp.concatenate(
                [t[b * num_heads + h] for h in range(num_heads)], axis=-1))
        return jnp.concatenate(rows, axis=0)

    # Static unroll over layers: activation never leaves VMEM.
    for l in range(num_layers):
        # ---- QKV projections: 2D matmuls over all B*S rows at once --------
        q = jnp.dot(x, wq_ref[l], preferred_element_type=jnp.float32) + bq_ref[l]
        k = jnp.dot(x, wk_ref[l], preferred_element_type=jnp.float32) + bk_ref[l]
        v = jnp.dot(x, wv_ref[l], preferred_element_type=jnp.float32) + bv_ref[l]

        # ---- multi-head attention: two batched dot_generals ----------------
        qh, kh, vh = split_heads(q), split_heads(k), split_heads(v)
        s = jnp.einsum("bqd,bkd->bqk", qh, kh,
                       preferred_element_type=jnp.float32) * scale
        s = s - jnp.max(s, axis=-1, keepdims=True)
        p = jnp.exp(s)
        p = p * pl.reciprocal(jnp.sum(p, axis=-1, keepdims=True), approx=True)
        a = jnp.einsum("bqk,bkd->bqd", p, vh,
                       preferred_element_type=jnp.float32)         # (B*H, S, dh)
        attn = merge_heads(a)                                       # (N, D)
        attn = jnp.dot(attn, wo_ref[l],
                       preferred_element_type=jnp.float32) + bo_ref[l]

        # ---- residual + LayerNorm1 (post-norm) ------------------------------
        y = _layer_norm(x + attn, n1w_ref[l], n1b_ref[l], eps)

        # ---- feed-forward: linear1 -> relu -> linear2 ------------------------
        h1 = jnp.dot(y, w1_ref[l], preferred_element_type=jnp.float32) + b1_ref[l]
        h1 = jnp.maximum(h1, 0.0)
        ff = jnp.dot(h1, w2_ref[l], preferred_element_type=jnp.float32) + b2_ref[l]

        # ---- residual + LayerNorm2 ------------------------------------------
        x = _layer_norm(y + ff, n2w_ref[l], n2b_ref[l], eps)

    out_ref[...] = x.astype(out_ref.dtype)


def _full_spec(shape):
    # Whole-array block, independent of the (trivial) grid index.
    nd = len(shape)
    return pl.BlockSpec(shape, lambda i, _nd=nd: (0,) * _nd)


# ------------------------------ wrapper --------------------------------------
def transformer_encoder_pallas(src_sbe, layer_params_list):
    """src_sbe: (S, B, D) seq-first, like PyTorch batch_first=False."""
    S, B, D = src_sbe.shape
    L = len(layer_params_list)

    # Single relayout in: (S, B, D) -> (B, S, D) -> (B*S, D) (reshape is free).
    x = jnp.transpose(src_sbe, (1, 0, 2)).reshape(B * S, D)

    def stack(name):
        return jnp.stack([p[name] for p in layer_params_list], axis=0)

    # Pre-split and pre-transpose every weight once, outside the kernel.
    in_proj_w = stack("in_proj_weight")                           # (L, 3D, D)
    in_proj_b = stack("in_proj_bias")                             # (L, 3D)
    wq_t = jnp.transpose(in_proj_w[:, 0 * D:1 * D, :], (0, 2, 1))  # (L, D, D)
    wk_t = jnp.transpose(in_proj_w[:, 1 * D:2 * D, :], (0, 2, 1))
    wv_t = jnp.transpose(in_proj_w[:, 2 * D:3 * D, :], (0, 2, 1))
    bq = in_proj_b[:, None, 0 * D:1 * D]                           # (L, 1, D)
    bk = in_proj_b[:, None, 1 * D:2 * D]
    bv = in_proj_b[:, None, 2 * D:3 * D]
    wo_t = jnp.transpose(stack("out_proj_weight"), (0, 2, 1))      # (L, D, D)
    bo = stack("out_proj_bias")[:, None, :]                        # (L, 1, D)
    n1w = stack("norm1_weight")[:, None, :]
    n1b = stack("norm1_bias")[:, None, :]
    n2w = stack("norm2_weight")[:, None, :]
    n2b = stack("norm2_bias")[:, None, :]
    w1_t = jnp.transpose(stack("linear1_weight"), (0, 2, 1))       # (L, D, F)
    b1 = stack("linear1_bias")[:, None, :]                         # (L, 1, F)
    w2_t = jnp.transpose(stack("linear2_weight"), (0, 2, 1))       # (L, F, D)
    b2 = stack("linear2_bias")[:, None, :]                         # (L, 1, D)

    weights = (wq_t, wk_t, wv_t, bq, bk, bv, wo_t, bo,
               n1w, n1b, n2w, n2b, w1_t, b1, w2_t, b2)

    kernel = functools.partial(
        fused_encoder_kernel, num_layers=L, num_heads=NHEAD,
        batch=B, seq=S, eps=LN_EPS)

    in_specs = [pl.BlockSpec((B * S, D), lambda i: (0, 0))]
    in_specs += [_full_spec(w.shape) for w in weights]

    out = pl.pallas_call(
        kernel,
        out_shape=jax.ShapeDtypeStruct((B * S, D), src_sbe.dtype),
        grid=(1,),
        in_specs=in_specs,
        out_specs=pl.BlockSpec((B * S, D), lambda i: (0, 0)),
        compiler_params=pltpu.CompilerParams(
            dimension_semantics=("arbitrary",),
        ),
    )(x, *weights)

    # Single relayout out: (B*S, D) -> (B, S, D) -> (S, B, D).
    return jnp.transpose(out.reshape(B, S, D), (1, 0, 2))


# ------------------------- pure-JAX reference --------------------------------
def _ref_layer(x, p):  # x: (B, S, D)
    D = x.shape[-1]
    dh = D // NHEAD
    qkv = jnp.einsum("bsd,ed->bse", x, p["in_proj_weight"]) + p["in_proj_bias"]
    q, k, v = qkv[..., :D], qkv[..., D:2 * D], qkv[..., 2 * D:]

    def split(t):  # (B, S, D) -> (B, H, S, dh)
        return t.reshape(x.shape[0], x.shape[1], NHEAD, dh).transpose(0, 2, 1, 3)

    qh, kh, vh = split(q), split(k), split(v)
    s = jnp.einsum("bhqd,bhkd->bhqk", qh, kh) / math.sqrt(dh)
    p_attn = jax.nn.softmax(s, axis=-1)
    a = jnp.einsum("bhqk,bhkd->bhqd", p_attn, vh)
    a = a.transpose(0, 2, 1, 3).reshape(x.shape)
    a = jnp.einsum("bsd,ed->bse", a, p["out_proj_weight"]) + p["out_proj_bias"]
    y = _layer_norm(x + a, p["norm1_weight"], p["norm1_bias"], LN_EPS)
    h1 = jax.nn.relu(jnp.einsum("bsd,fd->bsf", y, p["linear1_weight"]) + p["linear1_bias"])
    ff = jnp.einsum("bsf,df->bsd", h1, p["linear2_weight"]) + p["linear2_bias"]
    return _layer_norm(y + ff, p["norm2_weight"], p["norm2_bias"], LN_EPS)


def transformer_encoder_ref(src_sbe, layer_params_list):
    x = jnp.transpose(src_sbe, (1, 0, 2))
    for p in layer_params_list:
        x = _ref_layer(x, p)
    return jnp.transpose(x, (1, 0, 2))


# ------------------------- deterministic params ------------------------------
def make_layer_params(key):
    ks = jax.random.split(key, 6)
    scale = 0.05
    return {
        "in_proj_weight": scale * jax.random.normal(ks[0], (3 * D_MODEL, D_MODEL), jnp.float32),
        "in_proj_bias": jnp.zeros((3 * D_MODEL,), jnp.float32),
        "out_proj_weight": scale * jax.random.normal(ks[1], (D_MODEL, D_MODEL), jnp.float32),
        "out_proj_bias": jnp.zeros((D_MODEL,), jnp.float32),
        "norm1_weight": jnp.ones((D_MODEL,), jnp.float32),
        "norm1_bias": jnp.zeros((D_MODEL,), jnp.float32),
        "norm2_weight": jnp.ones((D_MODEL,), jnp.float32),
        "norm2_bias": jnp.zeros((D_MODEL,), jnp.float32),
        "linear1_weight": scale * jax.random.normal(ks[2], (DIM_FF, D_MODEL), jnp.float32),
        "linear1_bias": scale * jax.random.normal(ks[3], (DIM_FF,), jnp.float32),
        "linear2_weight": scale * jax.random.normal(ks[4], (D_MODEL, DIM_FF), jnp.float32),
        "linear2_bias": scale * jax.random.normal(ks[5], (D_MODEL,), jnp.float32),
    }


if __name__ == "__main__":
    key = jax.random.PRNGKey(0)
    k_src, *k_layers = jax.random.split(key, 1 + NUM_LAYERS)

    src = jax.random.normal(k_src, (SEQ, BATCH, D_MODEL), jnp.float32)  # (S, B, E)
    layer_params = [make_layer_params(k) for k in k_layers]

    out = jax.block_until_ready(transformer_encoder_pallas(src, layer_params))
    ref = jax.block_until_ready(transformer_encoder_ref(src, layer_params))

    # Slightly relaxed tolerance to cover the approx EUP reciprocal in softmax.
    np.testing.assert_allclose(np.asarray(out), np.asarray(ref), rtol=2e-3, atol=2e-3)

    print("KERNEL_OK")
</pallas_src>

<mosaic_0001>
module attributes {stable_mosaic.version = 11 : i64} {
  func.func @fused_encoder_kernel(%arg0: i32, %arg1: memref<16x32xf32, #tpu.memory_space<vmem>>, %arg2: memref<2x32x32xf32, #tpu.memory_space<vmem>>, %arg3: memref<2x32x32xf32, #tpu.memory_space<vmem>>, %arg4: memref<2x32x32xf32, #tpu.memory_space<vmem>>, %arg5: memref<2x1x32xf32, #tpu.memory_space<vmem>>, %arg6: memref<2x1x32xf32, #tpu.memory_space<vmem>>, %arg7: memref<2x1x32xf32, #tpu.memory_space<vmem>>, %arg8: memref<2x32x32xf32, #tpu.memory_space<vmem>>, %arg9: memref<2x1x32xf32, #tpu.memory_space<vmem>>, %arg10: memref<2x1x32xf32, #tpu.memory_space<vmem>>, %arg11: memref<2x1x32xf32, #tpu.memory_space<vmem>>, %arg12: memref<2x1x32xf32, #tpu.memory_space<vmem>>, %arg13: memref<2x1x32xf32, #tpu.memory_space<vmem>>, %arg14: memref<2x32x64xf32, #tpu.memory_space<vmem>>, %arg15: memref<2x1x64xf32, #tpu.memory_space<vmem>>, %arg16: memref<2x64x32xf32, #tpu.memory_space<vmem>>, %arg17: memref<2x1x32xf32, #tpu.memory_space<vmem>>, %arg18: memref<16x32xf32, #tpu.memory_space<vmem>>) attributes {dimension_semantics = [#tpu.dimension_semantics<arbitrary>], iteration_bounds = array<i64: 1>, scalar_prefetch = 0 : i64, scratch_operands = 0 : i64, tpu.core_type = #tpu.core_type<tc>, window_params = [{pipeline_mode = #tpu.pipeline_mode<synchronous>, transform_indices = @transform_0, window_bounds = array<i64: 16, 32>}, {pipeline_mode = #tpu.pipeline_mode<synchronous>, transform_indices = @transform_1, window_bounds = array<i64: 2, 32, 32>}, {pipeline_mode = #tpu.pipeline_mode<synchronous>, transform_indices = @transform_2, window_bounds = array<i64: 2, 32, 32>}, {pipeline_mode = #tpu.pipeline_mode<synchronous>, transform_indices = @transform_3, window_bounds = array<i64: 2, 32, 32>}, {pipeline_mode = #tpu.pipeline_mode<synchronous>, transform_indices = @transform_4, window_bounds = array<i64: 2, 1, 32>}, {pipeline_mode = #tpu.pipeline_mode<synchronous>, transform_indices = @transform_5, window_bounds = array<i64: 2, 1, 32>}, {pipeline_mode = #tpu.pipeline_mode<synchronous>, transform_indices = @transform_6, window_bounds = array<i64: 2, 1, 32>}, {pipeline_mode = #tpu.pipeline_mode<synchronous>, transform_indices = @transform_7, window_bounds = array<i64: 2, 32, 32>}, {pipeline_mode = #tpu.pipeline_mode<synchronous>, transform_indices = @transform_8, window_bounds = array<i64: 2, 1, 32>}, {pipeline_mode = #tpu.pipeline_mode<synchronous>, transform_indices = @transform_9, window_bounds = array<i64: 2, 1, 32>}, {pipeline_mode = #tpu.pipeline_mode<synchronous>, transform_indices = @transform_10, window_bounds = array<i64: 2, 1, 32>}, {pipeline_mode = #tpu.pipeline_mode<synchronous>, transform_indices = @transform_11, window_bounds = array<i64: 2, 1, 32>}, {pipeline_mode = #tpu.pipeline_mode<synchronous>, transform_indices = @transform_12, window_bounds = array<i64: 2, 1, 32>}, {pipeline_mode = #tpu.pipeline_mode<synchronous>, transform_indices = @transform_13, window_bounds = array<i64: 2, 32, 64>}, {pipeline_mode = #tpu.pipeline_mode<synchronous>, transform_indices = @transform_14, window_bounds = array<i64: 2, 1, 64>}, {pipeline_mode = #tpu.pipeline_mode<synchronous>, transform_indices = @transform_15, window_bounds = array<i64: 2, 64, 32>}, {pipeline_mode = #tpu.pipeline_mode<synchronous>, transform_indices = @transform_16, window_bounds = array<i64: 2, 1, 32>}, {pipeline_mode = #tpu.pipeline_mode<synchronous>, transform_indices = @transform_17, window_bounds = array<i64: 16, 32>}]} {
    %c0 = arith.constant 0 : index
    %c0_0 = arith.constant 0 : index
    %0 = vector.load %arg1[%c0, %c0_0] : memref<16x32xf32, #tpu.memory_space<vmem>>, vector<16x32xf32>
    %c0_1 = arith.constant 0 : index
    %c0_2 = arith.constant 0 : index
    %c0_3 = arith.constant 0 : index
    %1 = vector.load %arg2[%c0_1, %c0_2, %c0_3] : memref<2x32x32xf32, #tpu.memory_space<vmem>>, vector<1x32x32xf32>
    %2 = vector.shape_cast %1 : vector<1x32x32xf32> to vector<32x32xf32>
    %cst = arith.constant dense<0.000000e+00> : vector<16x32xf32>
    %3 = tpu.matmul %0, %2, %cst {dimension_numbers = #tpu.dot_dimension_numbers<[1], [0], [0], [1], [0, 0, 1, 1], [], []>} : vector<16x32xf32>, vector<32x32xf32>, vector<16x32xf32> -> vector<16x32xf32>
    %c0_4 = arith.constant 0 : index
    %c0_5 = arith.constant 0 : index
    %c0_6 = arith.constant 0 : index
    %4 = vector.load %arg5[%c0_4, %c0_5, %c0_6] : memref<2x1x32xf32, #tpu.memory_space<vmem>>, vector<1x1x32xf32>
    %5 = vector.shape_cast %4 : vector<1x1x32xf32> to vector<1x32xf32>
    %6 = vector.broadcast %5 : vector<1x32xf32> to vector<16x32xf32>
    %7 = arith.addf %3, %6 : vector<16x32xf32>
    %c0_7 = arith.constant 0 : index
    %c0_8 = arith.constant 0 : index
    %c0_9 = arith.constant 0 : index
    %8 = vector.load %arg3[%c0_7, %c0_8, %c0_9] : memref<2x32x32xf32, #tpu.memory_space<vmem>>, vector<1x32x32xf32>
    %9 = vector.shape_cast %8 : vector<1x32x32xf32> to vector<32x32xf32>
    %cst_10 = arith.constant dense<0.000000e+00> : vector<16x32xf32>
    %10 = tpu.matmul %0, %9, %cst_10 {dimension_numbers = #tpu.dot_dimension_numbers<[1], [0], [0], [1], [0, 0, 1, 1], [], []>} : vector<16x32xf32>, vector<32x32xf32>, vector<16x32xf32> -> vector<16x32xf32>
    %c0_11 = arith.constant 0 : index
    %c0_12 = arith.constant 0 : index
    %c0_13 = arith.constant 0 : index
    %11 = vector.load %arg6[%c0_11, %c0_12, %c0_13] : memref<2x1x32xf32, #tpu.memory_space<vmem>>, vector<1x1x32xf32>
    %12 = vector.shape_cast %11 : vector<1x1x32xf32> to vector<1x32xf32>
    %13 = vector.broadcast %12 : vector<1x32xf32> to vector<16x32xf32>
    %14 = arith.addf %10, %13 : vector<16x32xf32>
    %c0_14 = arith.constant 0 : index
    %c0_15 = arith.constant 0 : index
    %c0_16 = arith.constant 0 : index
    %15 = vector.load %arg4[%c0_14, %c0_15, %c0_16] : memref<2x32x32xf32, #tpu.memory_space<vmem>>, vector<1x32x32xf32>
    %16 = vector.shape_cast %15 : vector<1x32x32xf32> to vector<32x32xf32>
    %cst_17 = arith.constant dense<0.000000e+00> : vector<16x32xf32>
    %17 = tpu.matmul %0, %16, %cst_17 {dimension_numbers = #tpu.dot_dimension_numbers<[1], [0], [0], [1], [0, 0, 1, 1], [], []>} : vector<16x32xf32>, vector<32x32xf32>, vector<16x32xf32> -> vector<16x32xf32>
    %c0_18 = arith.constant 0 : index
    %c0_19 = arith.constant 0 : index
    %c0_20 = arith.constant 0 : index
    %18 = vector.load %arg7[%c0_18, %c0_19, %c0_20] : memref<2x1x32xf32, #tpu.memory_space<vmem>>, vector<1x1x32xf32>
    %19 = vector.shape_cast %18 : vector<1x1x32xf32> to vector<1x32xf32>
    %20 = vector.broadcast %19 : vector<1x32xf32> to vector<16x32xf32>
    %21 = arith.addf %17, %20 : vector<16x32xf32>
    %22 = vector.extract_strided_slice %7 {offsets = [0, 0], sizes = [8, 32], strides = [1, 1]} : vector<16x32xf32> to vector<8x32xf32>
    %23 = vector.extract_strided_slice %22 {offsets = [0, 0], sizes = [8, 8], strides = [1, 1]} : vector<8x32xf32> to vector<8x8xf32>
    %24 = vector.extract_strided_slice %22 {offsets = [0, 8], sizes = [8, 8], strides = [1, 1]} : vector<8x32xf32> to vector<8x8xf32>
    %25 = vector.extract_strided_slice %22 {offsets = [0, 16], sizes = [8, 8], strides = [1, 1]} : vector<8x32xf32> to vector<8x8xf32>
    %26 = vector.extract_strided_slice %22 {offsets = [0, 24], sizes = [8, 8], strides = [1, 1]} : vector<8x32xf32> to vector<8x8xf32>
    %27 = vector.extract_strided_slice %7 {offsets = [8, 0], sizes = [8, 32], strides = [1, 1]} : vector<16x32xf32> to vector<8x32xf32>
    %28 = vector.extract_strided_slice %27 {offsets = [0, 0], sizes = [8, 8], strides = [1, 1]} : vector<8x32xf32> to vector<8x8xf32>
    %29 = vector.extract_strided_slice %27 {offsets = [0, 8], sizes = [8, 8], strides = [1, 1]} : vector<8x32xf32> to vector<8x8xf32>
    %30 = vector.extract_strided_slice %27 {offsets = [0, 16], sizes = [8, 8], strides = [1, 1]} : vector<8x32xf32> to vector<8x8xf32>
    %31 = vector.extract_strided_slice %27 {offsets = [0, 24], sizes = [8, 8], strides = [1, 1]} : vector<8x32xf32> to vector<8x8xf32>
    %32 = vector.shape_cast %23 : vector<8x8xf32> to vector<1x8x8xf32>
    %33 = vector.shape_cast %24 : vector<8x8xf32> to vector<1x8x8xf32>
    %34 = vector.shape_cast %25 : vector<8x8xf32> to vector<1x8x8xf32>
    %35 = vector.shape_cast %26 : vector<8x8xf32> to vector<1x8x8xf32>
    %36 = vector.shape_cast %28 : vector<8x8xf32> to vector<1x8x8xf32>
    %37 = vector.shape_cast %29 : vector<8x8xf32> to vector<1x8x8xf32>
    %38 = vector.shape_cast %30 : vector<8x8xf32> to vector<1x8x8xf32>
    %39 = vector.shape_cast %31 : vector<8x8xf32> to vector<1x8x8xf32>
    %40 = tpu.concatenate %32, %33, %34, %35, %36, %37, %38, %39 in 0 : vector<1x8x8xf32>, vector<1x8x8xf32>, vector<1x8x8xf32>, vector<1x8x8xf32>, vector<1x8x8xf32>, vector<1x8x8xf32>, vector<1x8x8xf32>, vector<1x8x8xf32> -> vector<8x8x8xf32>
    %41 = vector.extract_strided_slice %14 {offsets = [0, 0], sizes = [8, 32], strides = [1, 1]} : vector<16x32xf32> to vector<8x32xf32>
    %42 = vector.extract_strided_slice %41 {offsets = [0, 0], sizes = [8, 8], strides = [1, 1]} : vector<8x32xf32> to vector<8x8xf32>
    %43 = vector.extract_strided_slice %41 {offsets = [0, 8], sizes = [8, 8], strides = [1, 1]} : vector<8x32xf32> to vector<8x8xf32>
    %44 = vector.extract_strided_slice %41 {offsets = [0, 16], sizes = [8, 8], strides = [1, 1]} : vector<8x32xf32> to vector<8x8xf32>
    %45 = vector.extract_strided_slice %41 {offsets = [0, 24], sizes = [8, 8], strides = [1, 1]} : vector<8x32xf32> to vector<8x8xf32>
    %46 = vector.extract_strided_slice %14 {offsets = [8, 0], sizes = [8, 32], strides = [1, 1]} : vector<16x32xf32> to vector<8x32xf32>
    %47 = vector.extract_strided_slice %46 {offsets = [0, 0], sizes = [8, 8], strides = [1, 1]} : vector<8x32xf32> to vector<8x8xf32>
    %48 = vector.extract_strided_slice %46 {offsets = [0, 8], sizes = [8, 8], strides = [1, 1]} : vector<8x32xf32> to vector<8x8xf32>
    %49 = vector.extract_strided_slice %46 {offsets = [0, 16], sizes = [8, 8], strides = [1, 1]} : vector<8x32xf32> to vector<8x8xf32>
    %50 = vector.extract_strided_slice %46 {offsets = [0, 24], sizes = [8, 8], strides = [1, 1]} : vector<8x32xf32> to vector<8x8xf32>
    %51 = vector.shape_cast %42 : vector<8x8xf32> to vector<1x8x8xf32>
    %52 = vector.shape_cast %43 : vector<8x8xf32> to vector<1x8x8xf32>
    %53 = vector.shape_cast %44 : vector<8x8xf32> to vector<1x8x8xf32>
    %54 = vector.shape_cast %45 : vector<8x8xf32> to vector<1x8x8xf32>
    %55 = vector.shape_cast %47 : vector<8x8xf32> to vector<1x8x8xf32>
    %56 = vector.shape_cast %48 : vector<8x8xf32> to vector<1x8x8xf32>
    %57 = vector.shape_cast %49 : vector<8x8xf32> to vector<1x8x8xf32>
    %58 = vector.shape_cast %50 : vector<8x8xf32> to vector<1x8x8xf32>
    %59 = tpu.concatenate %51, %52, %53, %54, %55, %56, %57, %58 in 0 : vector<1x8x8xf32>, vector<1x8x8xf32>, vector<1x8x8xf32>, vector<1x8x8xf32>, vector<1x8x8xf32>, vector<1x8x8xf32>, vector<1x8x8xf32>, vector<1x8x8xf32> -> vector<8x8x8xf32>
    %60 = vector.extract_strided_slice %21 {offsets = [0, 0], sizes = [8, 32], strides = [1, 1]} : vector<16x32xf32> to vector<8x32xf32>
    %61 = vector.extract_strided_slice %60 {offsets = [0, 0], sizes = [8, 8], strides = [1, 1]} : vector<8x32xf32> to vector<8x8xf32>
    %62 = vector.extract_strided_slice %60 {offsets = [0, 8], sizes = [8, 8], strides = [1, 1]} : vector<8x32xf32> to vector<8x8xf32>
    %63 = vector.extract_strided_slice %60 {offsets = [0, 16], sizes = [8, 8], strides = [1, 1]} : vector<8x32xf32> to vector<8x8xf32>
    %64 = vector.extract_strided_slice %60 {offsets = [0, 24], sizes = [8, 8], strides = [1, 1]} : vector<8x32xf32> to vector<8x8xf32>
    %65 = vector.extract_strided_slice %21 {offsets = [8, 0], sizes = [8, 32], strides = [1, 1]} : vector<16x32xf32> to vector<8x32xf32>
    %66 = vector.extract_strided_slice %65 {offsets = [0, 0], sizes = [8, 8], strides = [1, 1]} : vector<8x32xf32> to vector<8x8xf32>
    %67 = vector.extract_strided_slice %65 {offsets = [0, 8], sizes = [8, 8], strides = [1, 1]} : vector<8x32xf32> to vector<8x8xf32>
    %68 = vector.extract_strided_slice %65 {offsets = [0, 16], sizes = [8, 8], strides = [1, 1]} : vector<8x32xf32> to vector<8x8xf32>
    %69 = vector.extract_strided_slice %65 {offsets = [0, 24], sizes = [8, 8], strides = [1, 1]} : vector<8x32xf32> to vector<8x8xf32>
    %70 = vector.shape_cast %61 : vector<8x8xf32> to vector<1x8x8xf32>
    %71 = vector.shape_cast %62 : vector<8x8xf32> to vector<1x8x8xf32>
    %72 = vector.shape_cast %63 : vector<8x8xf32> to vector<1x8x8xf32>
    %73 = vector.shape_cast %64 : vector<8x8xf32> to vector<1x8x8xf32>
    %74 = vector.shape_cast %66 : vector<8x8xf32> to vector<1x8x8xf32>
    %75 = vector.shape_cast %67 : vector<8x8xf32> to vector<1x8x8xf32>
    %76 = vector.shape_cast %68 : vector<8x8xf32> to vector<1x8x8xf32>
    %77 = vector.shape_cast %69 : vector<8x8xf32> to vector<1x8x8xf32>
    %78 = tpu.concatenate %70, %71, %72, %73, %74, %75, %76, %77 in 0 : vector<1x8x8xf32>, vector<1x8x8xf32>, vector<1x8x8xf32>, vector<1x8x8xf32>, vector<1x8x8xf32>, vector<1x8x8xf32>, vector<1x8x8xf32>, vector<1x8x8xf32> -> vector<8x8x8xf32>
    "tpu.trace_start"() <{level = 10 : i32, message = "bqd,bkd->bqk"}> : () -> ()
    %cst_21 = arith.constant dense<0.000000e+00> : vector<8x8x8xf32>
    %79 = tpu.matmul %40, %59, %cst_21 {dimension_numbers = #tpu.dot_dimension_numbers<[2], [2], [1], [1], [0, 0, 0, 1, 1, 1], [0], [0]>} : vector<8x8x8xf32>, vector<8x8x8xf32>, vector<8x8x8xf32> -> vector<8x8x8xf32>
    "tpu.trace_stop"() : () -> ()
    %cst_22 = arith.constant 0.353553385 : f32
    %80 = vector.broadcast %cst_22 : f32 to vector<8x8x8xf32>
    %81 = arith.mulf %79, %80 : vector<8x8x8xf32>
    %cst_23 = arith.constant dense<0xFF800000> : vector<8x8xf32>
    %82 = vector.multi_reduction <maximumf>, %81, %cst_23 [2] : vector<8x8x8xf32> to vector<8x8xf32>
    %83 = vector.shape_cast %82 : vector<8x8xf32> to vector<8x8x1xf32>
    %84 = vector.broadcast %83 : vector<8x8x1xf32> to vector<8x8x8xf32>
    %85 = arith.subf %81, %84 : vector<8x8x8xf32>
    %86 = math.exp %85 : vector<8x8x8xf32>
    %cst_24 = arith.constant dense<0.000000e+00> : vector<8x8xf32>
    %87 = vector.multi_reduction <add>, %86, %cst_24 [2] : vector<8x8x8xf32> to vector<8x8xf32>
    %88 = vector.shape_cast %87 : vector<8x8xf32> to vector<8x8x1xf32>
    %89 = tpu.reciprocal %88 {approx = true} : vector<8x8x1xf32> -> vector<8x8x1xf32>
    %90 = vector.broadcast %89 : vector<8x8x1xf32> to vector<8x8x8xf32>
    %91 = arith.mulf %86, %90 : vector<8x8x8xf32>
    "tpu.trace_start"() <{level = 10 : i32, message = "bqk,bkd->bqd"}> : () -> ()
    %cst_25 = arith.constant dense<0.000000e+00> : vector<8x8x8xf32>
    %92 = tpu.matmul %91, %78, %cst_25 {dimension_numbers = #tpu.dot_dimension_numbers<[2], [1], [1], [2], [0, 0, 0, 1, 1, 2], [0], [0]>} : vector<8x8x8xf32>, vector<8x8x8xf32>, vector<8x8x8xf32> -> vector<8x8x8xf32>
    "tpu.trace_stop"() : () -> ()
    %93 = vector.extract_strided_slice %92 {offsets = [0, 0, 0], sizes = [1, 8, 8], strides = [1, 1, 1]} : vector<8x8x8xf32> to vector<1x8x8xf32>
    %94 = vector.shape_cast %93 : vector<1x8x8xf32> to vector<8x8xf32>
    %95 = vector.extract_strided_slice %92 {offsets = [1, 0, 0], sizes = [1, 8, 8], strides = [1, 1, 1]} : vector<8x8x8xf32> to vector<1x8x8xf32>
    %96 = vector.shape_cast %95 : vector<1x8x8xf32> to vector<8x8xf32>
    %97 = vector.extract_strided_slice %92 {offsets = [2, 0, 0], sizes = [1, 8, 8], strides = [1, 1, 1]} : vector<8x8x8xf32> to vector<1x8x8xf32>
    %98 = vector.shape_cast %97 : vector<1x8x8xf32> to vector<8x8xf32>
    %99 = vector.extract_strided_slice %92 {offsets = [3, 0, 0], sizes = [1, 8, 8], strides = [1, 1, 1]} : vector<8x8x8xf32> to vector<1x8x8xf32>
    %100 = vector.shape_cast %99 : vector<1x8x8xf32> to vector<8x8xf32>
    %101 = tpu.concatenate %94, %96, %98, %100 in 1 : vector<8x8xf32>, vector<8x8xf32>, vector<8x8xf32>, vector<8x8xf32> -> vector<8x32xf32>
    %102 = vector.extract_strided_slice %92 {offsets = [4, 0, 0], sizes = [1, 8, 8], strides = [1, 1, 1]} : vector<8x8x8xf32> to vector<1x8x8xf32>
    %103 = vector.shape_cast %102 : vector<1x8x8xf32> to vector<8x8xf32>
    %104 = vector.extract_strided_slice %92 {offsets = [5, 0, 0], sizes = [1, 8, 8], strides = [1, 1, 1]} : vector<8x8x8xf32> to vector<1x8x8xf32>
    %105 = vector.shape_cast %104 : vector<1x8x8xf32> to vector<8x8xf32>
    %106 = vector.extract_strided_slice %92 {offsets = [6, 0, 0], sizes = [1, 8, 8], strides = [1, 1, 1]} : vector<8x8x8xf32> to vector<1x8x8xf32>
    %107 = vector.shape_cast %106 : vector<1x8x8xf32> to vector<8x8xf32>
    %108 = vector.extract_strided_slice %92 {offsets = [7, 0, 0], sizes = [1, 8, 8], strides = [1, 1, 1]} : vector<8x8x8xf32> to vector<1x8x8xf32>
    %109 = vector.shape_cast %108 : vector<1x8x8xf32> to vector<8x8xf32>
    %110 = tpu.concatenate %103, %105, %107, %109 in 1 : vector<8x8xf32>, vector<8x8xf32>, vector<8x8xf32>, vector<8x8xf32> -> vector<8x32xf32>
    %111 = tpu.concatenate %101, %110 in 0 : vector<8x32xf32>, vector<8x32xf32> -> vector<16x32xf32>
    %c0_26 = arith.constant 0 : index
    %c0_27 = arith.constant 0 : index
    %c0_28 = arith.constant 0 : index
    %112 = vector.load %arg8[%c0_26, %c0_27, %c0_28] : memref<2x32x32xf32, #tpu.memory_space<vmem>>, vector<1x32x32xf32>
    %113 = vector.shape_cast %112 : vector<1x32x32xf32> to vector<32x32xf32>
    %cst_29 = arith.constant dense<0.000000e+00> : vector<16x32xf32>
    %114 = tpu.matmul %111, %113, %cst_29 {dimension_numbers = #tpu.dot_dimension_numbers<[1], [0], [0], [1], [0, 0, 1, 1], [], []>} : vector<16x32xf32>, vector<32x32xf32>, vector<16x32xf32> -> vector<16x32xf32>
    %c0_30 = arith.constant 0 : index
    %c0_31 = arith.constant 0 : index
    %c0_32 = arith.constant 0 : index
    %115 = vector.load %arg9[%c0_30, %c0_31, %c0_32] : memref<2x1x32xf32, #tpu.memory_space<vmem>>, vector<1x1x32xf32>
    %116 = vector.shape_cast %115 : vector<1x1x32xf32> to vector<1x32xf32>
    %117 = vector.broadcast %116 : vector<1x32xf32> to vector<16x32xf32>
    %118 = arith.addf %114, %117 : vector<16x32xf32>
    %119 = arith.addf %0, %118 : vector<16x32xf32>
    %c0_33 = arith.constant 0 : index
    %c0_34 = arith.constant 0 : index
    %c0_35 = arith.constant 0 : index
    %120 = vector.load %arg10[%c0_33, %c0_34, %c0_35] : memref<2x1x32xf32, #tpu.memory_space<vmem>>, vector<1x1x32xf32>
    %121 = vector.shape_cast %120 : vector<1x1x32xf32> to vector<1x32xf32>
    %c0_36 = arith.constant 0 : index
    %c0_37 = arith.constant 0 : index
    %c0_38 = arith.constant 0 : index
    %122 = vector.load %arg11[%c0_36, %c0_37, %c0_38] : memref<2x1x32xf32, #tpu.memory_space<vmem>>, vector<1x1x32xf32>
    %123 = vector.shape_cast %122 : vector<1x1x32xf32> to vector<1x32xf32>
    %cst_39 = arith.constant dense<0.000000e+00> : vector<16xf32>
    %124 = vector.multi_reduction <add>, %119, %cst_39 [1] : vector<16x32xf32> to vector<16xf32>
    %125 = vector.shape_cast %124 : vector<16xf32> to vector<16x1xf32>
    %cst_40 = arith.constant 3.200000e+01 : f32
    %126 = vector.broadcast %cst_40 : f32 to vector<16x1xf32>
    %127 = arith.divf %125, %126 : vector<16x1xf32>
    %128 = vector.broadcast %127 : vector<16x1xf32> to vector<16x32xf32>
    %129 = arith.subf %119, %128 : vector<16x32xf32>
    %130 = arith.mulf %129, %129 : vector<16x32xf32>
    %cst_41 = arith.constant dense<0.000000e+00> : vector<16xf32>
    %131 = vector.multi_reduction <add>, %130, %cst_41 [1] : vector<16x32xf32> to vector<16xf32>
    %132 = vector.shape_cast %131 : vector<16xf32> to vector<16x1xf32>
    %cst_42 = arith.constant 3.200000e+01 : f32
    %133 = vector.broadcast %cst_42 : f32 to vector<16x1xf32>
    %134 = arith.divf %132, %133 : vector<16x1xf32>
    %cst_43 = arith.constant 9.99999974E-6 : f32
    %135 = vector.broadcast %cst_43 : f32 to vector<16x1xf32>
    %136 = arith.addf %134, %135 : vector<16x1xf32>
    %137 = math.rsqrt %136 : vector<16x1xf32>
    %138 = vector.broadcast %137 : vector<16x1xf32> to vector<16x32xf32>
    %139 = arith.mulf %129, %138 : vector<16x32xf32>
    %140 = vector.broadcast %121 : vector<1x32xf32> to vector<16x32xf32>
    %141 = arith.mulf %139, %140 : vector<16x32xf32>
    %142 = vector.broadcast %123 : vector<1x32xf32> to vector<16x32xf32>
    %143 = arith.addf %141, %142 : vector<16x32xf32>
    %c0_44 = arith.constant 0 : index
    %c0_45 = arith.constant 0 : index
    %c0_46 = arith.constant 0 : index
    %144 = vector.load %arg14[%c0_44, %c0_45, %c0_46] : memref<2x32x64xf32, #tpu.memory_space<vmem>>, vector<1x32x64xf32>
    %145 = vector.shape_cast %144 : vector<1x32x64xf32> to vector<32x64xf32>
    %cst_47 = arith.constant dense<0.000000e+00> : vector<16x64xf32>
    %146 = tpu.matmul %143, %145, %cst_47 {dimension_numbers = #tpu.dot_dimension_numbers<[1], [0], [0], [1], [0, 0, 1, 1], [], []>} : vector<16x32xf32>, vector<32x64xf32>, vector<16x64xf32> -> vector<16x64xf32>
    %c0_48 = arith.constant 0 : index
    %c0_49 = arith.constant 0 : index
    %c0_50 = arith.constant 0 : index
    %147 = vector.load %arg15[%c0_48, %c0_49, %c0_50] : memref<2x1x64xf32, #tpu.memory_space<vmem>>, vector<1x1x64xf32>
    %148 = vector.shape_cast %147 : vector<1x1x64xf32> to vector<1x64xf32>
    %149 = vector.broadcast %148 : vector<1x64xf32> to vector<16x64xf32>
    %150 = arith.addf %146, %149 : vector<16x64xf32>
    %cst_51 = arith.constant 0.000000e+00 : f32
    %151 = vector.broadcast %cst_51 : f32 to vector<16x64xf32>
    %152 = arith.maximumf %150, %151 : vector<16x64xf32>
    %c0_52 = arith.constant 0 : index
    %c0_53 = arith.constant 0 : index
    %c0_54 = arith.constant 0 : index
    %153 = vector.load %arg16[%c0_52, %c0_53, %c0_54] : memref<2x64x32xf32, #tpu.memory_space<vmem>>, vector<1x64x32xf32>
    %154 = vector.shape_cast %153 : vector<1x64x32xf32> to vector<64x32xf32>
    %cst_55 = arith.constant dense<0.000000e+00> : vector<16x32xf32>
    %155 = tpu.matmul %152, %154, %cst_55 {dimension_numbers = #tpu.dot_dimension_numbers<[1], [0], [0], [1], [0, 0, 1, 1], [], []>} : vector<16x64xf32>, vector<64x32xf32>, vector<16x32xf32> -> vector<16x32xf32>
    %c0_56 = arith.constant 0 : index
    %c0_57 = arith.constant 0 : index
    %c0_58 = arith.constant 0 : index
    %156 = vector.load %arg17[%c0_56, %c0_57, %c0_58] : memref<2x1x32xf32, #tpu.memory_space<vmem>>, vector<1x1x32xf32>
    %157 = vector.shape_cast %156 : vector<1x1x32xf32> to vector<1x32xf32>
    %158 = vector.broadcast %157 : vector<1x32xf32> to vector<16x32xf32>
    %159 = arith.addf %155, %158 : vector<16x32xf32>
    %160 = arith.addf %143, %159 : vector<16x32xf32>
    %c0_59 = arith.constant 0 : index
    %c0_60 = arith.constant 0 : index
    %c0_61 = arith.constant 0 : index
    %161 = vector.load %arg12[%c0_59, %c0_60, %c0_61] : memref<2x1x32xf32, #tpu.memory_space<vmem>>, vector<1x1x32xf32>
    %162 = vector.shape_cast %161 : vector<1x1x32xf32> to vector<1x32xf32>
    %c0_62 = arith.constant 0 : index
    %c0_63 = arith.constant 0 : index
    %c0_64 = arith.constant 0 : index
    %163 = vector.load %arg13[%c0_62, %c0_63, %c0_64] : memref<2x1x32xf32, #tpu.memory_space<vmem>>, vector<1x1x32xf32>
    %164 = vector.shape_cast %163 : vector<1x1x32xf32> to vector<1x32xf32>
    %cst_65 = arith.constant dense<0.000000e+00> : vector<16xf32>
    %165 = vector.multi_reduction <add>, %160, %cst_65 [1] : vector<16x32xf32> to vector<16xf32>
    %166 = vector.shape_cast %165 : vector<16xf32> to vector<16x1xf32>
    %cst_66 = arith.constant 3.200000e+01 : f32
    %167 = vector.broadcast %cst_66 : f32 to vector<16x1xf32>
    %168 = arith.divf %166, %167 : vector<16x1xf32>
    %169 = vector.broadcast %168 : vector<16x1xf32> to vector<16x32xf32>
    %170 = arith.subf %160, %169 : vector<16x32xf32>
    %171 = arith.mulf %170, %170 : vector<16x32xf32>
    %cst_67 = arith.constant dense<0.000000e+00> : vector<16xf32>
    %172 = vector.multi_reduction <add>, %171, %cst_67 [1] : vector<16x32xf32> to vector<16xf32>
    %173 = vector.shape_cast %172 : vector<16xf32> to vector<16x1xf32>
    %cst_68 = arith.constant 3.200000e+01 : f32
    %174 = vector.broadcast %cst_68 : f32 to vector<16x1xf32>
    %175 = arith.divf %173, %174 : vector<16x1xf32>
    %cst_69 = arith.constant 9.99999974E-6 : f32
    %176 = vector.broadcast %cst_69 : f32 to vector<16x1xf32>
    %177 = arith.addf %175, %176 : vector<16x1xf32>
    %178 = math.rsqrt %177 : vector<16x1xf32>
    %179 = vector.broadcast %178 : vector<16x1xf32> to vector<16x32xf32>
    %180 = arith.mulf %170, %179 : vector<16x32xf32>
    %181 = vector.broadcast %162 : vector<1x32xf32> to vector<16x32xf32>
    %182 = arith.mulf %180, %181 : vector<16x32xf32>
    %183 = vector.broadcast %164 : vector<1x32xf32> to vector<16x32xf32>
    %184 = arith.addf %182, %183 : vector<16x32xf32>
    %c1 = arith.constant 1 : index
    %c0_70 = arith.constant 0 : index
    %c0_71 = arith.constant 0 : index
    %185 = vector.load %arg2[%c1, %c0_70, %c0_71] : memref<2x32x32xf32, #tpu.memory_space<vmem>>, vector<1x32x32xf32>
    %186 = vector.shape_cast %185 : vector<1x32x32xf32> to vector<32x32xf32>
    %cst_72 = arith.constant dense<0.000000e+00> : vector<16x32xf32>
    %187 = tpu.matmul %184, %186, %cst_72 {dimension_numbers = #tpu.dot_dimension_numbers<[1], [0], [0], [1], [0, 0, 1, 1], [], []>} : vector<16x32xf32>, vector<32x32xf32>, vector<16x32xf32> -> vector<16x32xf32>
    %c1_73 = arith.constant 1 : index
    %c0_74 = arith.constant 0 : index
    %c0_75 = arith.constant 0 : index
    %188 = vector.load %arg5[%c1_73, %c0_74, %c0_75] : memref<2x1x32xf32, #tpu.memory_space<vmem>>, vector<1x1x32xf32>
    %189 = vector.shape_cast %188 : vector<1x1x32xf32> to vector<1x32xf32>
    %190 = vector.broadcast %189 : vector<1x32xf32> to vector<16x32xf32>
    %191 = arith.addf %187, %190 : vector<16x32xf32>
    %c1_76 = arith.constant 1 : index
    %c0_77 = arith.constant 0 : index
    %c0_78 = arith.constant 0 : index
    %192 = vector.load %arg3[%c1_76, %c0_77, %c0_78] : memref<2x32x32xf32, #tpu.memory_space<vmem>>, vector<1x32x32xf32>
    %193 = vector.shape_cast %192 : vector<1x32x32xf32> to vector<32x32xf32>
    %cst_79 = arith.constant dense<0.000000e+00> : vector<16x32xf32>
    %194 = tpu.matmul %184, %193, %cst_79 {dimension_numbers = #tpu.dot_dimension_numbers<[1], [0], [0], [1], [0, 0, 1, 1], [], []>} : vector<16x32xf32>, vector<32x32xf32>, vector<16x32xf32> -> vector<16x32xf32>
    %c1_80 = arith.constant 1 : index
    %c0_81 = arith.constant 0 : index
    %c0_82 = arith.constant 0 : index
    %195 = vector.load %arg6[%c1_80, %c0_81, %c0_82] : memref<2x1x32xf32, #tpu.memory_space<vmem>>, vector<1x1x32xf32>
    %196 = vector.shape_cast %195 : vector<1x1x32xf32> to vector<1x32xf32>
    %197 = vector.broadcast %196 : vector<1x32xf32> to vector<16x32xf32>
    %198 = arith.addf %194, %197 : vector<16x32xf32>
    %c1_83 = arith.constant 1 : index
    %c0_84 = arith.constant 0 : index
    %c0_85 = arith.constant 0 : index
    %199 = vector.load %arg4[%c1_83, %c0_84, %c0_85] : memref<2x32x32xf32, #tpu.memory_space<vmem>>, vector<1x32x32xf32>
    %200 = vector.shape_cast %199 : vector<1x32x32xf32> to vector<32x32xf32>
    %cst_86 = arith.constant dense<0.000000e+00> : vector<16x32xf32>
    %201 = tpu.matmul %184, %200, %cst_86 {dimension_numbers = #tpu.dot_dimension_numbers<[1], [0], [0], [1], [0, 0, 1, 1], [], []>} : vector<16x32xf32>, vector<32x32xf32>, vector<16x32xf32> -> vector<16x32xf32>
    %c1_87 = arith.constant 1 : index
    %c0_88 = arith.constant 0 : index
    %c0_89 = arith.constant 0 : index
    %202 = vector.load %arg7[%c1_87, %c0_88, %c0_89] : memref<2x1x32xf32, #tpu.memory_space<vmem>>, vector<1x1x32xf32>
    %203 = vector.shape_cast %202 : vector<1x1x32xf32> to vector<1x32xf32>
    %204 = vector.broadcast %203 : vector<1x32xf32> to vector<16x32xf32>
    %205 = arith.addf %201, %204 : vector<16x32xf32>
    %206 = vector.extract_strided_slice %191 {offsets = [0, 0], sizes = [8, 32], strides = [1, 1]} : vector<16x32xf32> to vector<8x32xf32>
    %207 = vector.extract_strided_slice %206 {offsets = [0, 0], sizes = [8, 8], strides = [1, 1]} : vector<8x32xf32> to vector<8x8xf32>
    %208 = vector.extract_strided_slice %206 {offsets = [0, 8], sizes = [8, 8], strides = [1, 1]} : vector<8x32xf32> to vector<8x8xf32>
    %209 = vector.extract_strided_slice %206 {offsets = [0, 16], sizes = [8, 8], strides = [1, 1]} : vector<8x32xf32> to vector<8x8xf32>
    %210 = vector.extract_strided_slice %206 {offsets = [0, 24], sizes = [8, 8], strides = [1, 1]} : vector<8x32xf32> to vector<8x8xf32>
    %211 = vector.extract_strided_slice %191 {offsets = [8, 0], sizes = [8, 32], strides = [1, 1]} : vector<16x32xf32> to vector<8x32xf32>
    %212 = vector.extract_strided_slice %211 {offsets = [0, 0], sizes = [8, 8], strides = [1, 1]} : vector<8x32xf32> to vector<8x8xf32>
    %213 = vector.extract_strided_slice %211 {offsets = [0, 8], sizes = [8, 8], strides = [1, 1]} : vector<8x32xf32> to vector<8x8xf32>
    %214 = vector.extract_strided_slice %211 {offsets = [0, 16], sizes = [8, 8], strides = [1, 1]} : vector<8x32xf32> to vector<8x8xf32>
    %215 = vector.extract_strided_slice %211 {offsets = [0, 24], sizes = [8, 8], strides = [1, 1]} : vector<8x32xf32> to vector<8x8xf32>
    %216 = vector.shape_cast %207 : vector<8x8xf32> to vector<1x8x8xf32>
    %217 = vector.shape_cast %208 : vector<8x8xf32> to vector<1x8x8xf32>
    %218 = vector.shape_cast %209 : vector<8x8xf32> to vector<1x8x8xf32>
    %219 = vector.shape_cast %210 : vector<8x8xf32> to vector<1x8x8xf32>
    %220 = vector.shape_cast %212 : vector<8x8xf32> to vector<1x8x8xf32>
    %221 = vector.shape_cast %213 : vector<8x8xf32> to vector<1x8x8xf32>
    %222 = vector.shape_cast %214 : vector<8x8xf32> to vector<1x8x8xf32>
    %223 = vector.shape_cast %215 : vector<8x8xf32> to vector<1x8x8xf32>
    %224 = tpu.concatenate %216, %217, %218, %219, %220, %221, %222, %223 in 0 : vector<1x8x8xf32>, vector<1x8x8xf32>, vector<1x8x8xf32>, vector<1x8x8xf32>, vector<1x8x8xf32>, vector<1x8x8xf32>, vector<1x8x8xf32>, vector<1x8x8xf32> -> vector<8x8x8xf32>
    %225 = vector.extract_strided_slice %198 {offsets = [0, 0], sizes = [8, 32], strides = [1, 1]} : vector<16x32xf32> to vector<8x32xf32>
    %226 = vector.extract_strided_slice %225 {offsets = [0, 0], sizes = [8, 8], strides = [1, 1]} : vector<8x32xf32> to vector<8x8xf32>
    %227 = vector.extract_strided_slice %225 {offsets = [0, 8], sizes = [8, 8], strides = [1, 1]} : vector<8x32xf32> to vector<8x8xf32>
    %228 = vector.extract_strided_slice %225 {offsets = [0, 16], sizes = [8, 8], strides = [1, 1]} : vector<8x32xf32> to vector<8x8xf32>
    %229 = vector.extract_strided_slice %225 {offsets = [0, 24], sizes = [8, 8], strides = [1, 1]} : vector<8x32xf32> to vector<8x8xf32>
    %230 = vector.extract_strided_slice %198 {offsets = [8, 0], sizes = [8, 32], strides = [1, 1]} : vector<16x32xf32> to vector<8x32xf32>
    %231 = vector.extract_strided_slice %230 {offsets = [0, 0], sizes = [8, 8], strides = [1, 1]} : vector<8x32xf32> to vector<8x8xf32>
    %232 = vector.extract_strided_slice %230 {offsets = [0, 8], sizes = [8, 8], strides = [1, 1]} : vector<8x32xf32> to vector<8x8xf32>
    %233 = vector.extract_strided_slice %230 {offsets = [0, 16], sizes = [8, 8], strides = [1, 1]} : vector<8x32xf32> to vector<8x8xf32>
    %234 = vector.extract_strided_slice %230 {offsets = [0, 24], sizes = [8, 8], strides = [1, 1]} : vector<8x32xf32> to vector<8x8xf32>
    %235 = vector.shape_cast %226 : vector<8x8xf32> to vector<1x8x8xf32>
    %236 = vector.shape_cast %227 : vector<8x8xf32> to vector<1x8x8xf32>
    %237 = vector.shape_cast %228 : vector<8x8xf32> to vector<1x8x8xf32>
    %238 = vector.shape_cast %229 : vector<8x8xf32> to vector<1x8x8xf32>
    %239 = vector.shape_cast %231 : vector<8x8xf32> to vector<1x8x8xf32>
    %240 = vector.shape_cast %232 : vector<8x8xf32> to vector<1x8x8xf32>
    %241 = vector.shape_cast %233 : vector<8x8xf32> to vector<1x8x8xf32>
    %242 = vector.shape_cast %234 : vector<8x8xf32> to vector<1x8x8xf32>
    %243 = tpu.concatenate %235, %236, %237, %238, %239, %240, %241, %242 in 0 : vector<1x8x8xf32>, vector<1x8x8xf32>, vector<1x8x8xf32>, vector<1x8x8xf32>, vector<1x8x8xf32>, vector<1x8x8xf32>, vector<1x8x8xf32>, vector<1x8x8xf32> -> vector<8x8x8xf32>
    %244 = vector.extract_strided_slice %205 {offsets = [0, 0], sizes = [8, 32], strides = [1, 1]} : vector<16x32xf32> to vector<8x32xf32>
    %245 = vector.extract_strided_slice %244 {offsets = [0, 0], sizes = [8, 8], strides = [1, 1]} : vector<8x32xf32> to vector<8x8xf32>
    %246 = vector.extract_strided_slice %244 {offsets = [0, 8], sizes = [8, 8], strides = [1, 1]} : vector<8x32xf32> to vector<8x8xf32>
    %247 = vector.extract_strided_slice %244 {offsets = [0, 16], sizes = [8, 8], strides = [1, 1]} : vector<8x32xf32> to vector<8x8xf32>
    %248 = vector.extract_strided_slice %244 {offsets = [0, 24], sizes = [8, 8], strides = [1, 1]} : vector<8x32xf32> to vector<8x8xf32>
    %249 = vector.extract_strided_slice %205 {offsets = [8, 0], sizes = [8, 32], strides = [1, 1]} : vector<16x32xf32> to vector<8x32xf32>
    %250 = vector.extract_strided_slice %249 {offsets = [0, 0], sizes = [8, 8], strides = [1, 1]} : vector<8x32xf32> to vector<8x8xf32>
    %251 = vector.extract_strided_slice %249 {offsets = [0, 8], sizes = [8, 8], strides = [1, 1]} : vector<8x32xf32> to vector<8x8xf32>
    %252 = vector.extract_strided_slice %249 {offsets = [0, 16], sizes = [8, 8], strides = [1, 1]} : vector<8x32xf32> to vector<8x8xf32>
    %253 = vector.extract_strided_slice %249 {offsets = [0, 24], sizes = [8, 8], strides = [1, 1]} : vector<8x32xf32> to vector<8x8xf32>
    %254 = vector.shape_cast %245 : vector<8x8xf32> to vector<1x8x8xf32>
    %255 = vector.shape_cast %246 : vector<8x8xf32> to vector<1x8x8xf32>
    %256 = vector.shape_cast %247 : vector<8x8xf32> to vector<1x8x8xf32>
    %257 = vector.shape_cast %248 : vector<8x8xf32> to vector<1x8x8xf32>
    %258 = vector.shape_cast %250 : vector<8x8xf32> to vector<1x8x8xf32>
    %259 = vector.shape_cast %251 : vector<8x8xf32> to vector<1x8x8xf32>
    %260 = vector.shape_cast %252 : vector<8x8xf32> to vector<1x8x8xf32>
    %261 = vector.shape_cast %253 : vector<8x8xf32> to vector<1x8x8xf32>
    %262 = tpu.concatenate %254, %255, %256, %257, %258, %259, %260, %261 in 0 : vector<1x8x8xf32>, vector<1x8x8xf32>, vector<1x8x8xf32>, vector<1x8x8xf32>, vector<1x8x8xf32>, vector<1x8x8xf32>, vector<1x8x8xf32>, vector<1x8x8xf32> -> vector<8x8x8xf32>
    "tpu.trace_start"() <{level = 10 : i32, message = "bqd,bkd->bqk"}> : () -> ()
    %cst_90 = arith.constant dense<0.000000e+00> : vector<8x8x8xf32>
    %263 = tpu.matmul %224, %243, %cst_90 {dimension_numbers = #tpu.dot_dimension_numbers<[2], [2], [1], [1], [0, 0, 0, 1, 1, 1], [0], [0]>} : vector<8x8x8xf32>, vector<8x8x8xf32>, vector<8x8x8xf32> -> vector<8x8x8xf32>
    "tpu.trace_stop"() : () -> ()
    %cst_91 = arith.constant 0.353553385 : f32
    %264 = vector.broadcast %cst_91 : f32 to vector<8x8x8xf32>
    %265 = arith.mulf %263, %264 : vector<8x8x8xf32>
    %cst_92 = arith.constant dense<0xFF800000> : vector<8x8xf32>
    %266 = vector.multi_reduction <maximumf>, %265, %cst_92 [2] : vector<8x8x8xf32> to vector<8x8xf32>
    %267 = vector.shape_cast %266 : vector<8x8xf32> to vector<8x8x1xf32>
    %268 = vector.broadcast %267 : vector<8x8x1xf32> to vector<8x8x8xf32>
    %269 = arith.subf %265, %268 : vector<8x8x8xf32>
    %270 = math.exp %269 : vector<8x8x8xf32>
    %cst_93 = arith.constant dense<0.000000e+00> : vector<8x8xf32>
    %271 = vector.multi_reduction <add>, %270, %cst_93 [2] : vector<8x8x8xf32> to vector<8x8xf32>
    %272 = vector.shape_cast %271 : vector<8x8xf32> to vector<8x8x1xf32>
    %273 = tpu.reciprocal %272 {approx = true} : vector<8x8x1xf32> -> vector<8x8x1xf32>
    %274 = vector.broadcast %273 : vector<8x8x1xf32> to vector<8x8x8xf32>
    %275 = arith.mulf %270, %274 : vector<8x8x8xf32>
    "tpu.trace_start"() <{level = 10 : i32, message = "bqk,bkd->bqd"}> : () -> ()
    %cst_94 = arith.constant dense<0.000000e+00> : vector<8x8x8xf32>
    %276 = tpu.matmul %275, %262, %cst_94 {dimension_numbers = #tpu.dot_dimension_numbers<[2], [1], [1], [2], [0, 0, 0, 1, 1, 2], [0], [0]>} : vector<8x8x8xf32>, vector<8x8x8xf32>, vector<8x8x8xf32> -> vector<8x8x8xf32>
    "tpu.trace_stop"() : () -> ()
    %277 = vector.extract_strided_slice %276 {offsets = [0, 0, 0], sizes = [1, 8, 8], strides = [1, 1, 1]} : vector<8x8x8xf32> to vector<1x8x8xf32>
    %278 = vector.shape_cast %277 : vector<1x8x8xf32> to vector<8x8xf32>
    %279 = vector.extract_strided_slice %276 {offsets = [1, 0, 0], sizes = [1, 8, 8], strides = [1, 1, 1]} : vector<8x8x8xf32> to vector<1x8x8xf32>
    %280 = vector.shape_cast %279 : vector<1x8x8xf32> to vector<8x8xf32>
    %281 = vector.extract_strided_slice %276 {offsets = [2, 0, 0], sizes = [1, 8, 8], strides = [1, 1, 1]} : vector<8x8x8xf32> to vector<1x8x8xf32>
    %282 = vector.shape_cast %281 : vector<1x8x8xf32> to vector<8x8xf32>
    %283 = vector.extract_strided_slice %276 {offsets = [3, 0, 0], sizes = [1, 8, 8], strides = [1, 1, 1]} : vector<8x8x8xf32> to vector<1x8x8xf32>
    %284 = vector.shape_cast %283 : vector<1x8x8xf32> to vector<8x8xf32>
    %285 = tpu.concatenate %278, %280, %282, %284 in 1 : vector<8x8xf32>, vector<8x8xf32>, vector<8x8xf32>, vector<8x8xf32> -> vector<8x32xf32>
    %286 = vector.extract_strided_slice %276 {offsets = [4, 0, 0], sizes = [1, 8, 8], strides = [1, 1, 1]} : vector<8x8x8xf32> to vector<1x8x8xf32>
    %287 = vector.shape_cast %286 : vector<1x8x8xf32> to vector<8x8xf32>
    %288 = vector.extract_strided_slice %276 {offsets = [5, 0, 0], sizes = [1, 8, 8], strides = [1, 1, 1]} : vector<8x8x8xf32> to vector<1x8x8xf32>
    %289 = vector.shape_cast %288 : vector<1x8x8xf32> to vector<8x8xf32>
    %290 = vector.extract_strided_slice %276 {offsets = [6, 0, 0], sizes = [1, 8, 8], strides = [1, 1, 1]} : vector<8x8x8xf32> to vector<1x8x8xf32>
    %291 = vector.shape_cast %290 : vector<1x8x8xf32> to vector<8x8xf32>
    %292 = vector.extract_strided_slice %276 {offsets = [7, 0, 0], sizes = [1, 8, 8], strides = [1, 1, 1]} : vector<8x8x8xf32> to vector<1x8x8xf32>
    %293 = vector.shape_cast %292 : vector<1x8x8xf32> to vector<8x8xf32>
    %294 = tpu.concatenate %287, %289, %291, %293 in 1 : vector<8x8xf32>, vector<8x8xf32>, vector<8x8xf32>, vector<8x8xf32> -> vector<8x32xf32>
    %295 = tpu.concatenate %285, %294 in 0 : vector<8x32xf32>, vector<8x32xf32> -> vector<16x32xf32>
    %c1_95 = arith.constant 1 : index
    %c0_96 = arith.constant 0 : index
    %c0_97 = arith.constant 0 : index
    %296 = vector.load %arg8[%c1_95, %c0_96, %c0_97] : memref<2x32x32xf32, #tpu.memory_space<vmem>>, vector<1x32x32xf32>
    %297 = vector.shape_cast %296 : vector<1x32x32xf32> to vector<32x32xf32>
    %cst_98 = arith.constant dense<0.000000e+00> : vector<16x32xf32>
    %298 = tpu.matmul %295, %297, %cst_98 {dimension_numbers = #tpu.dot_dimension_numbers<[1], [0], [0], [1], [0, 0, 1, 1], [], []>} : vector<16x32xf32>, vector<32x32xf32>, vector<16x32xf32> -> vector<16x32xf32>
    %c1_99 = arith.constant 1 : index
    %c0_100 = arith.constant 0 : index
    %c0_101 = arith.constant 0 : index
    %299 = vector.load %arg9[%c1_99, %c0_100, %c0_101] : memref<2x1x32xf32, #tpu.memory_space<vmem>>, vector<1x1x32xf32>
    %300 = vector.shape_cast %299 : vector<1x1x32xf32> to vector<1x32xf32>
    %301 = vector.broadcast %300 : vector<1x32xf32> to vector<16x32xf32>
    %302 = arith.addf %298, %301 : vector<16x32xf32>
    %303 = arith.addf %184, %302 : vector<16x32xf32>
    %c1_102 = arith.constant 1 : index
    %c0_103 = arith.constant 0 : index
    %c0_104 = arith.constant 0 : index
    %304 = vector.load %arg10[%c1_102, %c0_103, %c0_104] : memref<2x1x32xf32, #tpu.memory_space<vmem>>, vector<1x1x32xf32>
    %305 = vector.shape_cast %304 : vector<1x1x32xf32> to vector<1x32xf32>
    %c1_105 = arith.constant 1 : index
    %c0_106 = arith.constant 0 : index
    %c0_107 = arith.constant 0 : index
    %306 = vector.load %arg11[%c1_105, %c0_106, %c0_107] : memref<2x1x32xf32, #tpu.memory_space<vmem>>, vector<1x1x32xf32>
    %307 = vector.shape_cast %306 : vector<1x1x32xf32> to vector<1x32xf32>
    %cst_108 = arith.constant dense<0.000000e+00> : vector<16xf32>
    %308 = vector.multi_reduction <add>, %303, %cst_108 [1] : vector<16x32xf32> to vector<16xf32>
    %309 = vector.shape_cast %308 : vector<16xf32> to vector<16x1xf32>
    %cst_109 = arith.constant 3.200000e+01 : f32
    %310 = vector.broadcast %cst_109 : f32 to vector<16x1xf32>
    %311 = arith.divf %309, %310 : vector<16x1xf32>
    %312 = vector.broadcast %311 : vector<16x1xf32> to vector<16x32xf32>
    %313 = arith.subf %303, %312 : vector<16x32xf32>
    %314 = arith.mulf %313, %313 : vector<16x32xf32>
    %cst_110 = arith.constant dense<0.000000e+00> : vector<16xf32>
    %315 = vector.multi_reduction <add>, %314, %cst_110 [1] : vector<16x32xf32> to vector<16xf32>
    %316 = vector.shape_cast %315 : vector<16xf32> to vector<16x1xf32>
    %cst_111 = arith.constant 3.200000e+01 : f32
    %317 = vector.broadcast %cst_111 : f32 to vector<16x1xf32>
    %318 = arith.divf %316, %317 : vector<16x1xf32>
    %cst_112 = arith.constant 9.99999974E-6 : f32
    %319 = vector.broadcast %cst_112 : f32 to vector<16x1xf32>
    %320 = arith.addf %318, %319 : vector<16x1xf32>
    %321 = math.rsqrt %320 : vector<16x1xf32>
    %322 = vector.broadcast %321 : vector<16x1xf32> to vector<16x32xf32>
    %323 = arith.mulf %313, %322 : vector<16x32xf32>
    %324 = vector.broadcast %305 : vector<1x32xf32> to vector<16x32xf32>
    %325 = arith.mulf %323, %324 : vector<16x32xf32>
    %326 = vector.broadcast %307 : vector<1x32xf32> to vector<16x32xf32>
    %327 = arith.addf %325, %326 : vector<16x32xf32>
    %c1_113 = arith.constant 1 : index
    %c0_114 = arith.constant 0 : index
    %c0_115 = arith.constant 0 : index
    %328 = vector.load %arg14[%c1_113, %c0_114, %c0_115] : memref<2x32x64xf32, #tpu.memory_space<vmem>>, vector<1x32x64xf32>
    %329 = vector.shape_cast %328 : vector<1x32x64xf32> to vector<32x64xf32>
    %cst_116 = arith.constant dense<0.000000e+00> : vector<16x64xf32>
    %330 = tpu.matmul %327, %329, %cst_116 {dimension_numbers = #tpu.dot_dimension_numbers<[1], [0], [0], [1], [0, 0, 1, 1], [], []>} : vector<16x32xf32>, vector<32x64xf32>, vector<16x64xf32> -> vector<16x64xf32>
    %c1_117 = arith.constant 1 : index
    %c0_118 = arith.constant 0 : index
    %c0_119 = arith.constant 0 : index
    %331 = vector.load %arg15[%c1_117, %c0_118, %c0_119] : memref<2x1x64xf32, #tpu.memory_space<vmem>>, vector<1x1x64xf32>
    %332 = vector.shape_cast %331 : vector<1x1x64xf32> to vector<1x64xf32>
    %333 = vector.broadcast %332 : vector<1x64xf32> to vector<16x64xf32>
    %334 = arith.addf %330, %333 : vector<16x64xf32>
    %cst_120 = arith.constant 0.000000e+00 : f32
    %335 = vector.broadcast %cst_120 : f32 to vector<16x64xf32>
    %336 = arith.maximumf %334, %335 : vector<16x64xf32>
    %c1_121 = arith.constant 1 : index
    %c0_122 = arith.constant 0 : index
    %c0_123 = arith.constant 0 : index
    %337 = vector.load %arg16[%c1_121, %c0_122, %c0_123] : memref<2x64x32xf32, #tpu.memory_space<vmem>>, vector<1x64x32xf32>
    %338 = vector.shape_cast %337 : vector<1x64x32xf32> to vector<64x32xf32>
    %cst_124 = arith.constant dense<0.000000e+00> : vector<16x32xf32>
    %339 = tpu.matmul %336, %338, %cst_124 {dimension_numbers = #tpu.dot_dimension_numbers<[1], [0], [0], [1], [0, 0, 1, 1], [], []>} : vector<16x64xf32>, vector<64x32xf32>, vector<16x32xf32> -> vector<16x32xf32>
    %c1_125 = arith.constant 1 : index
    %c0_126 = arith.constant 0 : index
    %c0_127 = arith.constant 0 : index
    %340 = vector.load %arg17[%c1_125, %c0_126, %c0_127] : memref<2x1x32xf32, #tpu.memory_space<vmem>>, vector<1x1x32xf32>
    %341 = vector.shape_cast %340 : vector<1x1x32xf32> to vector<1x32xf32>
    %342 = vector.broadcast %341 : vector<1x32xf32> to vector<16x32xf32>
    %343 = arith.addf %339, %342 : vector<16x32xf32>
    %344 = arith.addf %327, %343 : vector<16x32xf32>
    %c1_128 = arith.constant 1 : index
    %c0_129 = arith.constant 0 : index
    %c0_130 = arith.constant 0 : index
    %345 = vector.load %arg12[%c1_128, %c0_129, %c0_130] : memref<2x1x32xf32, #tpu.memory_space<vmem>>, vector<1x1x32xf32>
    %346 = vector.shape_cast %345 : vector<1x1x32xf32> to vector<1x32xf32>
    %c1_131 = arith.constant 1 : index
    %c0_132 = arith.constant 0 : index
    %c0_133 = arith.constant 0 : index
    %347 = vector.load %arg13[%c1_131, %c0_132, %c0_133] : memref<2x1x32xf32, #tpu.memory_space<vmem>>, vector<1x1x32xf32>
    %348 = vector.shape_cast %347 : vector<1x1x32xf32> to vector<1x32xf32>
    %cst_134 = arith.constant dense<0.000000e+00> : vector<16xf32>
    %349 = vector.multi_reduction <add>, %344, %cst_134 [1] : vector<16x32xf32> to vector<16xf32>
    %350 = vector.shape_cast %349 : vector<16xf32> to vector<16x1xf32>
    %cst_135 = arith.constant 3.200000e+01 : f32
    %351 = vector.broadcast %cst_135 : f32 to vector<16x1xf32>
    %352 = arith.divf %350, %351 : vector<16x1xf32>
    %353 = vector.broadcast %352 : vector<16x1xf32> to vector<16x32xf32>
    %354 = arith.subf %344, %353 : vector<16x32xf32>
    %355 = arith.mulf %354, %354 : vector<16x32xf32>
    %cst_136 = arith.constant dense<0.000000e+00> : vector<16xf32>
    %356 = vector.multi_reduction <add>, %355, %cst_136 [1] : vector<16x32xf32> to vector<16xf32>
    %357 = vector.shape_cast %356 : vector<16xf32> to vector<16x1xf32>
    %cst_137 = arith.constant 3.200000e+01 : f32
    %358 = vector.broadcast %cst_137 : f32 to vector<16x1xf32>
    %359 = arith.divf %357, %358 : vector<16x1xf32>
    %cst_138 = arith.constant 9.99999974E-6 : f32
    %360 = vector.broadcast %cst_138 : f32 to vector<16x1xf32>
    %361 = arith.addf %359, %360 : vector<16x1xf32>
    %362 = math.rsqrt %361 : vector<16x1xf32>
    %363 = vector.broadcast %362 : vector<16x1xf32> to vector<16x32xf32>
    %364 = arith.mulf %354, %363 : vector<16x32xf32>
    %365 = vector.broadcast %346 : vector<1x32xf32> to vector<16x32xf32>
    %366 = arith.mulf %364, %365 : vector<16x32xf32>
    %367 = vector.broadcast %348 : vector<1x32xf32> to vector<16x32xf32>
    %368 = arith.addf %366, %367 : vector<16x32xf32>
    %c0_139 = arith.constant 0 : index
    %c0_140 = arith.constant 0 : index
    %369 = vector.load %arg18[%c0_139, %c0_140] : memref<16x32xf32, #tpu.memory_space<vmem>>, vector<16x32xf32>
    tpu.vector_store %arg18[%c0_139, %c0_140], %368 {strides = array<i32>} : memref<16x32xf32, #tpu.memory_space<vmem>>, vector<16x32xf32>,
    return
  }
  func.func @transform_0(%arg0: i32) -> (i32, i32) {
    %c0_i32 = arith.constant 0 : i32
    %c0_i32_0 = arith.constant 0 : i32
    %c0_i32_1 = arith.constant 0 : i32
    return %c0_i32, %c0_i32_0 : i32, i32
  }
  func.func @transform_1(%arg0: i32) -> (i32, i32, i32) {
    %c0_i32 = arith.constant 0 : i32
    %c0_i32_0 = arith.constant 0 : i32
    %c0_i32_1 = arith.constant 0 : i32
    %c0_i32_2 = arith.constant 0 : i32
    return %c0_i32, %c0_i32_0, %c0_i32_1 : i32, i32, i32
  }
  func.func @transform_2(%arg0: i32) -> (i32, i32, i32) {
    %c0_i32 = arith.constant 0 : i32
    %c0_i32_0 = arith.constant 0 : i32
    %c0_i32_1 = arith.constant 0 : i32
    %c0_i32_2 = arith.constant 0 : i32
    return %c0_i32, %c0_i32_0, %c0_i32_1 : i32, i32, i32
  }
  func.func @transform_3(%arg0: i32) -> (i32, i32, i32) {
    %c0_i32 = arith.constant 0 : i32
    %c0_i32_0 = arith.constant 0 : i32
    %c0_i32_1 = arith.constant 0 : i32
    %c0_i32_2 = arith.constant 0 : i32
    return %c0_i32, %c0_i32_0, %c0_i32_1 : i32, i32, i32
  }
  func.func @transform_4(%arg0: i32) -> (i32, i32, i32) {
    %c0_i32 = arith.constant 0 : i32
    %c0_i32_0 = arith.constant 0 : i32
    %c0_i32_1 = arith.constant 0 : i32
    %c0_i32_2 = arith.constant 0 : i32
    return %c0_i32, %c0_i32_0, %c0_i32_1 : i32, i32, i32
  }
  func.func @transform_5(%arg0: i32) -> (i32, i32, i32) {
    %c0_i32 = arith.constant 0 : i32
    %c0_i32_0 = arith.constant 0 : i32
    %c0_i32_1 = arith.constant 0 : i32
    %c0_i32_2 = arith.constant 0 : i32
    return %c0_i32, %c0_i32_0, %c0_i32_1 : i32, i32, i32
  }
  func.func @transform_6(%arg0: i32) -> (i32, i32, i32) {
    %c0_i32 = arith.constant 0 : i32
    %c0_i32_0 = arith.constant 0 : i32
    %c0_i32_1 = arith.constant 0 : i32
    %c0_i32_2 = arith.constant 0 : i32
    return %c0_i32, %c0_i32_0, %c0_i32_1 : i32, i32, i32
  }
  func.func @transform_7(%arg0: i32) -> (i32, i32, i32) {
    %c0_i32 = arith.constant 0 : i32
    %c0_i32_0 = arith.constant 0 : i32
    %c0_i32_1 = arith.constant 0 : i32
    %c0_i32_2 = arith.constant 0 : i32
    return %c0_i32, %c0_i32_0, %c0_i32_1 : i32, i32, i32
  }
  func.func @transform_8(%arg0: i32) -> (i32, i32, i32) {
    %c0_i32 = arith.constant 0 : i32
    %c0_i32_0 = arith.constant 0 : i32
    %c0_i32_1 = arith.constant 0 : i32
    %c0_i32_2 = arith.constant 0 : i32
    return %c0_i32, %c0_i32_0, %c0_i32_1 : i32, i32, i32
  }
  func.func @transform_9(%arg0: i32) -> (i32, i32, i32) {
    %c0_i32 = arith.constant 0 : i32
    %c0_i32_0 = arith.constant 0 : i32
    %c0_i32_1 = arith.constant 0 : i32
    %c0_i32_2 = arith.constant 0 : i32
    return %c0_i32, %c0_i32_0, %c0_i32_1 : i32, i32, i32
  }
  func.func @transform_10(%arg0: i32) -> (i32, i32, i32) {
    %c0_i32 = arith.constant 0 : i32
    %c0_i32_0 = arith.constant 0 : i32
    %c0_i32_1 = arith.constant 0 : i32
    %c0_i32_2 = arith.constant 0 : i32
    return %c0_i32, %c0_i32_0, %c0_i32_1 : i32, i32, i32
  }
  func.func @transform_11(%arg0: i32) -> (i32, i32, i32) {
    %c0_i32 = arith.constant 0 : i32
    %c0_i32_0 = arith.constant 0 : i32
    %c0_i32_1 = arith.constant 0 : i32
    %c0_i32_2 = arith.constant 0 : i32
    return %c0_i32, %c0_i32_0, %c0_i32_1 : i32, i32, i32
  }
  func.func @transform_12(%arg0: i32) -> (i32, i32, i32) {
    %c0_i32 = arith.constant 0 : i32
    %c0_i32_0 = arith.constant 0 : i32
    %c0_i32_1 = arith.constant 0 : i32
    %c0_i32_2 = arith.constant 0 : i32
    return %c0_i32, %c0_i32_0, %c0_i32_1 : i32, i32, i32
  }
  func.func @transform_13(%arg0: i32) -> (i32, i32, i32) {
    %c0_i32 = arith.constant 0 : i32
    %c0_i32_0 = arith.constant 0 : i32
    %c0_i32_1 = arith.constant 0 : i32
    %c0_i32_2 = arith.constant 0 : i32
    return %c0_i32, %c0_i32_0, %c0_i32_1 : i32, i32, i32
  }
  func.func @transform_14(%arg0: i32) -> (i32, i32, i32) {
    %c0_i32 = arith.constant 0 : i32
    %c0_i32_0 = arith.constant 0 : i32
    %c0_i32_1 = arith.constant 0 : i32
    %c0_i32_2 = arith.constant 0 : i32
    return %c0_i32, %c0_i32_0, %c0_i32_1 : i32, i32, i32
  }
  func.func @transform_15(%arg0: i32) -> (i32, i32, i32) {
    %c0_i32 = arith.constant 0 : i32
    %c0_i32_0 = arith.constant 0 : i32
    %c0_i32_1 = arith.constant 0 : i32
    %c0_i32_2 = arith.constant 0 : i32
    return %c0_i32, %c0_i32_0, %c0_i32_1 : i32, i32, i32
  }
  func.func @transform_16(%arg0: i32) -> (i32, i32, i32) {
    %c0_i32 = arith.constant 0 : i32
    %c0_i32_0 = arith.constant 0 : i32
    %c0_i32_1 = arith.constant 0 : i32
    %c0_i32_2 = arith.constant 0 : i32
    return %c0_i32, %c0_i32_0, %c0_i32_1 : i32, i32, i32
  }
  func.func @transform_17(%arg0: i32) -> (i32, i32) {
    %c0_i32 = arith.constant 0 : i32
    %c0_i32_0 = arith.constant 0 : i32
    %c0_i32_1 = arith.constant 0 : i32
    return %c0_i32, %c0_i32_0 : i32, i32
  }
}

</mosaic_0001>

<bundles_post_ra>
// kernel: tpu_custom_call.1
= control target key start
LH: loop header
LB: loop body
LE: loop exit
PB: predicated region body
PF: predicated region fallthrough
CT: control target
= control target key end

     0   :  { %s5667_s0 = inlined_call_operand.hbm [shape: f32[16,32], index: 0, kind: input, shape index: {}]   ;;  %s5668_s1 = inlined_call_operand.vmem [shape: f32[2,32,32], index: 1, kind: input, shape index: {}]   ;;  %s5669_s2 = inlined_call_operand.vmem [shape: f32[2,32,32], index: 2, kind: input, shape index: {}]   ;;  %s5670_s3 = inlined_call_operand.vmem [shape: f32[2,32,32], index: 3, kind: input, shape index: {}]   ;;  %s5671_s4 = inlined_call_operand.vmem [shape: f32[2,1,32], index: 4, kind: input, shape index: {}]   ;;  %s5672_s5 = inlined_call_operand.vmem [shape: f32[2,1,32], index: 5, kind: input, shape index: {}]   ;;  %s5673_s6 = inlined_call_operand.vmem [shape: f32[2,1,32], index: 6, kind: input, shape index: {}]   ;;  %s5674_s7 = inlined_call_operand.hbm [shape: f32[2,32,32], index: 7, kind: input, shape index: {}]   ;;  %s5675_s8 = inlined_call_operand.vmem [shape: f32[2,1,32], index: 8, kind: input, shape index: {}]   ;;  %s5676_s9 = inlined_call_operand.vmem [shape: f32[2,1,32], index: 9, kind: input, shape index: {}]   ;;  %s5677_s10 = inlined_call_operand.vmem [shape: f32[2,1,32], index: 10, kind: input, shape index: {}]   ;;  %s5678_s11 = inlined_call_operand.vmem [shape: f32[2,1,32], index: 11, kind: input, shape index: {}]   ;;  %s5679_s12 = inlined_call_operand.vmem [shape: f32[2,1,32], index: 12, kind: input, shape index: {}]   ;;  %s5680_s13 = inlined_call_operand.hbm [shape: f32[2,32,64], index: 13, kind: input, shape index: {}]   ;;  %s5681_s14 = inlined_call_operand.vmem [shape: f32[2,1,64], index: 14, kind: input, shape index: {}]   ;;  %s5682_s15 = inlined_call_operand.vmem [shape: f32[2,64,32], index: 15, kind: input, shape index: {}]   ;;  %s5683_s16 = inlined_call_operand.vmem [shape: f32[2,1,32], index: 16, kind: input, shape index: {}]   ;;  %s5684_s17 = inlined_call_operand.hbm [shape: f32[16,32], index: 17, kind: output, shape index: {}]  }
   0x1   :  { %5688 = sst [smem:[#allocation12_spill]] %s5667_s0 }
   0x2   :  { %5689 = sst [smem:[#allocation13_spill]] %s5668_s1 }
   0x3   :  { %22 = vsyncpa [#allocation3], 0 }
   0x4   :  { %23 = vsyncpa [#allocation6], 0 }
   0x5   :  { %24 = vsyncpa [#allocation4], 0  ;;  %s4991_s24 = smov [#allocation5]   ;;  %s4992_s26 = smov [#allocation2]  }
   0x6   :  { %s54_s25 = sshll.u32 %s4991_s24, 4  ;;  %s30_s27 = sshll.u32 %s4992_s26, 4  ;;  %s55_s25 = int_to_ptr.vmem [resolvable:$true] %s54_s25  ;;  %s5094_s27 = int_to_ptr.vmem [resolvable:$true] %s30_s27 }
   0x7   :  { %s4897_s0 = scalar_lea.hbm %s5674_s7, 1024 }
   0x8   :  { %p4898_p0 = scmp.ne.s32.totalorder %s5674_s7, %s4897_s0  ;;  %p4901_p1 = scmp.lt.u32.totalorder %s4897_s0, %s5674_s7 }
   0xa   :  { %p4903_p2 = pnand %p4901_p1, %p4898_p0 }
   0xc   :  { %4906 = shalt.err (!%p4903_p2)
}
   0xd   :  { %s4907_s20 = scalar_lea.vmem %s55_s25, 1024  ;;  %p4912_p4 = scmp.lt.s32.totalorder %s55_s25, %s55_s25 }
   0xe   :  { %p4908_p3 = scmp.ne.s32.totalorder %s55_s25, %s4907_s20  ;;  %p4913_p5 = scmp.lt.s32.totalorder %s4907_s20, %s4907_s20 }
  0x10   :  { %p4914_p6 = por %p4913_p5, %p4912_p4 }
  0x12   :  { %p4915_p7 = pnand %p4914_p6, %p4908_p3 }
  0x14   :  { %4918 = shalt.err (!%p4915_p7)
}
  0x15   :  { %s5687_s21 = smov 128   ;;  %s4994_s22 = smov 8  }
  0x16   :  { %60 = dma.hbm_to_vmem [thread:$0]  %s5674_s7, 1024, %s55_s25, [#allocation6], %s5687_s21, %s5687_s21, %s4994_s22  }
  0x17   :  { %s5690_s29 = sld [smem:[#allocation12_spill]] }
  0x1d   :  { %s4919_s0 = scalar_lea.hbm %s5690_s29, 256 }
  0x1e   :  { %p4920_p8 = scmp.ne.s32.totalorder %s5690_s29, %s4919_s0  ;;  %p4923_p9 = scmp.lt.u32.totalorder %s4919_s0, %s5690_s29 }
  0x20   :  { %p4925_p10 = pnand %p4923_p9, %p4920_p8 }
  0x22   :  { %4928 = shalt.err (!%p4925_p10)
}
  0x23   :  { %s4929_s20 = scalar_lea.vmem %s5094_s27, 256  ;;  %p4934_p12 = scmp.lt.s32.totalorder %s5094_s27, %s5094_s27 }
  0x24   :  { %p4930_p11 = scmp.ne.s32.totalorder %s5094_s27, %s4929_s20  ;;  %p4935_p13 = scmp.lt.s32.totalorder %s4929_s20, %s4929_s20 }
  0x26   :  { %p4936_p0 = por %p4935_p13, %p4934_p12 }
  0x28   :  { %p4937_p1 = pnand %p4936_p0, %p4930_p11 }
  0x2a   :  { %4940 = shalt.err (!%p4937_p1)
}
  0x2b   :  { %36 = dma.hbm_to_vmem [thread:$0]  %s5690_s29, 256, %s5094_s27, [#allocation3], %s5687_s21, %s5687_s21, %s4994_s22  }
  0x2c   :  { %s4995_s23 = smov [#allocation7]   ;;  %s4941_s0 = scalar_lea.hbm %s5680_s13, 1024 }
  0x2d   :  { %s76_s24 = sshll.u32 %s4995_s23, 4  ;;  %p4942_p2 = scmp.ne.s32.totalorder %s5680_s13, %s4941_s0  ;;  %s77_s24 = int_to_ptr.vmem [resolvable:$true] %s76_s24 }
  0x2e   :  { %p4945_p3 = scmp.lt.u32.totalorder %s4941_s0, %s5680_s13 }
  0x30   :  { %p4947_p4 = pnand %p4945_p3, %p4942_p2 }
  0x32   :  { %4950 = shalt.err (!%p4947_p4)
}
  0x33   :  { %s4951_s20 = scalar_lea.vmem %s77_s24, 1024  ;;  %p4956_p6 = scmp.lt.s32.totalorder %s77_s24, %s77_s24 }
  0x34   :  { %p4952_p5 = scmp.ne.s32.totalorder %s77_s24, %s4951_s20  ;;  %p4957_p7 = scmp.lt.s32.totalorder %s4951_s20, %s4951_s20 }
  0x36   :  { %p4958_p8 = por %p4957_p7, %p4956_p6 }
  0x38   :  { %p4959_p9 = pnand %p4958_p8, %p4952_p5 }
  0x3a   :  { %4962 = shalt.err (!%p4959_p9)
}
  0x3b   :  { %82 = dma.hbm_to_vmem [thread:$0]  %s5680_s13, 1024, %s77_s24, [#allocation6], %s5687_s21, %s5687_s21, %s4994_s22  }
  0x3c   :  { %4985 = dma.done.wait [#allocation3], 256  }
  0x3d   :  { %4986 = vsyncadd [#allocation3], 4294967040 }
  0x3e   :  { %4987 = dma.done.wait [#allocation6], 2048  }
  0x3f   :  { %4988 = vsyncadd [#allocation6], 4294965248  ;;  %vm111_vm0 = vcmask 261120   ;;  %s5691_s23 = sld [smem:[#allocation13_spill]]  ;;  %v5158_v5 = vld [vmem:[#allocation2] sm:$0xff]  ;;  %v194_v8 = vld [vmem:[%s5669_s2 + $0x8] sm:$0xff] }
  0x40   :  { %4392 = vmatprep.mubr.msk.f32.mxu1 %vm111_vm0, %v5158_v5  ;;  %v193_v7 = vld [vmem:[%s5669_s2] sm:$0xff]  ;;  %4414 = vmatprep.mubr.msk.f32.mxu0 %vm111_vm0, %v5158_v5  ;;  %v195_v10 = vld [vmem:[%s5669_s2 + $0x10] sm:$0xff]  ;;  %v196_v11 = vld [vmem:[%s5669_s2 + $0x18] sm:$0xff]  ;;  %v4996_v14 = vmov 0.0   ;;  %vm4997_vm1 = vmmov 0   ;;  %s4998_s27 = smov 104  }
  0x41   :  { %v4700_v9 = vpack.c.bf16 %v194_v8, %v193_v7  ;;  %v5176_v12 = vld [vmem:[#allocation2 + $0x8] sm:$0xff]  ;;  %v4704_v13 = vpack.c.bf16 %v196_v11, %v195_v10  ;;  %v279_v15 = vld [vmem:[%s5670_s3] sm:$0xff]  ;;  %v281_v17 = vld [vmem:[%s5670_s3 + $0x10] sm:$0xff]  ;;  %s4999_s29 = smov 120   ;;  %vm413_vm2 = vcmask 64512   ;;  %s5000_s26 = smov 112  }
  0x42   :  { %v280_v16 = vld [vmem:[%s5670_s3 + $0x8] sm:$0xff]  ;;  %v282_v19 = vld [vmem:[%s5670_s3 + $0x18] sm:$0xff]  ;;  %v4118_v21 = vld [vmem:[%s5671_s4] ss:$0 sm:$0xff]  ;;  %s5001_s30 = smov 16   ;;  %s5002_s18 = smov 24  }
  0x43   :  { %v4708_v18 = vpack.c.bf16 %v280_v16, %v279_v15  ;;  %v4712_v20 = vpack.c.bf16 %v282_v19, %v281_v17  ;;  %v4121_v25 = vld [vmem:[%s5672_s5] ss:$0 sm:$0xff]  ;;  %vm1699_vm3 = vcmask 130048   ;;  %vm1701_vm4 = vcmask 195584  }
  0x44   :  { %v4124_v31 = vld [vmem:[%s5673_s6] ss:$0 sm:$0xff]  ;;  %vm1966_vm5 = vcmask 523264  }
  0x45   :  { %v100_v0 = vld [vmem:[%s5691_s23] sm:$0xff]  ;;  %v101_v1 = vld [vmem:[%s5691_s23 + $0x8] sm:$0xff]  ;;  %v102_v2 = vld [vmem:[%s5691_s23 + $0x10] sm:$0xff]  ;;  %4709 = vmatprep.subr.bf16.mxu0 %v4708_v18 }
  0x46   :  { %v4692_v3 = vpack.c.bf16 %v101_v1, %v100_v0  ;;  %v103_v4 = vld [vmem:[%s5691_s23 + $0x18] sm:$0xff]  ;;  %4711 = vmatpush3.bf16.msra.mxu0 %v4708_v18 }
  0x47   :  { %v4696_v6 = vpack.c.bf16 %v103_v4, %v102_v2  ;;  %4713 = vmatprep.subr.bf16.mxu0 %v4712_v20 }
  0x48   :  { %4693 = vmatprep.subr.bf16.mxu1 %v4692_v3 }
  0x49   :  { %4695 = vmatpush3.bf16.msra.mxu1 %v4692_v3 }
  0x4a   :  { %4697 = vmatprep.subr.bf16.mxu1 %v4696_v6  ;;  %4715 = vmatpush3.bf16.msra.mxu0 %v4712_v20 }
  0x4b   :  { %4427 = vmatprep.subr.mxu0 %v4996_v14 }
  0x4d   :  { %4699 = vmatpush3.bf16.msra.mxu1 %v4696_v6  ;;  %4415 = vmatmul.mubr.msk.f32.vlgmr.msra.gmra.mrb[0].mxu0 %vm111_vm0, %v5176_v12 }
  0x4e   :  { %4701 = vmatprep.subr.bf16.mxu1 %v4700_v9  ;;  %4429 = vmatprep.mubr.msk.f32.mxu0 %vm4997_vm1, %v4996_v14 }
  0x50   :  { %4393 = vmatmul.mubr.msk.f32.vlgmr.msra.gmra.mrb[0].mxu1 %vm111_vm0, %v5176_v12 }
  0x51   :  { %4703 = vmatpush3.bf16.msra.mxu1 %v4700_v9  ;;  %4403 = vmatprep.mubr.msk.f32.mxu1 %vm111_vm0, %v5158_v5 }
  0x52   :  { %4705 = vmatprep.subr.bf16.mxu1 %v4704_v13 }
  0x55   :  { %4707 = vmatpush3.bf16.msra.mxu1 %v4704_v13 }
  0x56   :  { %4417 = vmatprep.subr.mxu1 %v4996_v14 }
  0x58   :  { %4404 = vmatmul.mubr.msk.f32.vlgmr.msra.gmra.mrb[2].mxu1 %vm111_vm0, %v5176_v12 }
  0x59   :  { %4419 = vmatprep.mubr.msk.f32.mxu1 %vm4997_vm1, %v4996_v14 }
 0x120   :  { %v4416_v34 = vpop.f32.mrb[0].mxu0 }
 0x121   :  { %v5230_v35 = vadd.f32 %v4416_v34, %v4124_v31  ;;  %v356_v36 = vpop.f32.mrb[1].mxu0 }
 0x122   :  { %v357_v45 = vadd.f32 %v4124_v31, %v356_v36 }
 0x123   :  { %v4394_v22 = vpop.f32.mrb[0].mxu1 }
 0x124   :  { %v184_v23 = vpop.f32.mrb[1].mxu1  ;;  %v190_v29 = vadd.f32 %v4394_v22, %v4118_v21 }
 0x125   :  { %v185_v24 = vadd.f32 %v4118_v21, %v184_v23 }
 0x127   :  { %370 = vrot.lane.b32.xlu1 %v185_v24, %s4998_s27  ;;  %366 = vrot.lane.b32.xlu0 %v185_v24, %s4999_s29 }
 0x12b   :  { %v4405_v26 = vpop.f32.mrb[2].mxu1 }
 0x12c   :  { %v270_v27 = vpop.f32.mrb[3].mxu1  ;;  %v276_v30 = vadd.f32 %v4405_v26, %v4121_v25 }
 0x12d   :  { %v271_v28 = vadd.f32 %v4121_v25, %v270_v27 }
 0x12f   :  { %4418 = vmatpush3.xpose.msk.msra.mxu1 %vm413_vm2, %v271_v28  ;;  %382 = vrot.lane.b32.xlu1 %v271_v28, %s5000_s26 }
 0x130   :  { %380 = vrot.lane.b32.xlu0 %v271_v28, %s4999_s29  ;;  %4422 = vmatprep.subr.mxu1 %v4996_v14 }
 0x132   :  { %4420 = vmatmul.mubr.msk.f32.vlgmr.msra.gmra.mrb[4].mxu1 %vm413_vm2, %v185_v24 }
 0x133   :  { %384 = vrot.lane.b32.xlu1 %v271_v28, %s4998_s27  ;;  %4424 = vmatprep.mubr.msk.f32.mxu1 %vm4997_vm1, %v4996_v14 }
 0x134   :  { %368 = vrot.lane.b32.xlu0 %v185_v24, %s5000_s26 }
 0x137   :  { %373 = vrot.lane.b32.xlu1 %v190_v29, %s4999_s29 }
 0x138   :  { %387 = vrot.lane.b32.xlu0 %v276_v30, %s4999_s29 }
 0x13b   :  { %391 = vrot.lane.b32.xlu1 %v276_v30, %s4998_s27 }
 0x13c   :  { %389 = vrot.lane.b32.xlu0 %v276_v30, %s5000_s26 }
 0x13f   :  { %377 = vrot.lane.b32.xlu1 %v190_v29, %s4998_s27 }
 0x140   :  { %375 = vrot.lane.b32.xlu0 %v190_v29, %s5000_s26 }
 0x199   :  { %v371_v32 = vpop.permute.xlu1 %370  ;;  %v367_v33 = vpop.permute.xlu0 %366 }
 0x1a1   :  { %v383_v37 = vpop.permute.xlu1 %382 }
 0x1a2   :  { %v381_v38 = vpop.permute.xlu0 %380  ;;  %4428 = vmatpush3.xpose.msk.msra.mxu0 %vm413_vm2, %v383_v37 }
 0x1a3   :  { %4423 = vmatpush3.xpose.msk.msra.mxu1 %vm413_vm2, %v381_v38  ;;  %4437 = vmatprep.subr.mxu0 %v4996_v14 }
 0x1a4   :  { %4432 = vmatprep.subr.mxu1 %v4996_v14 }
 0x1a5   :  { %v385_v39 = vpop.permute.xlu1 %384 }
 0x1a6   :  { %v369_v40 = vpop.permute.xlu0 %368  ;;  %4425 = vmatmul.mubr.msk.f32.vlgmr.msra.gmra.mrb[6].mxu1 %vm413_vm2, %v367_v33 }
 0x1a7   :  { %4430 = vmatmul.mubr.msk.f32.vlgmr.msra.gmra.mrb[2].mxu0 %vm413_vm2, %v369_v40  ;;  %4433 = vmatpush3.xpose.msk.msra.mxu1 %vm413_vm2, %v385_v39 }
 0x1a8   :  { %4438 = vmatpush3.xpose.msk.msra.mxu0 %vm413_vm2, %v276_v30  ;;  %4434 = vmatprep.mubr.msk.f32.mxu1 %vm4997_vm1, %v4996_v14 }
 0x1a9   :  { %v374_v41 = vpop.permute.xlu1 %373  ;;  %4439 = vmatprep.mubr.msk.f32.mxu0 %vm4997_vm1, %v4996_v14  ;;  %4442 = vmatprep.subr.mxu1 %v4996_v14 }
 0x1aa   :  { %v388_v42 = vpop.permute.xlu0 %387  ;;  %4435 = vmatmul.mubr.msk.f32.vlgmr.msra.gmra.mrb[8].mxu1 %vm413_vm2, %v371_v32  ;;  %4447 = vmatprep.subr.mxu0 %v4996_v14 }
 0x1ab   :  { %4440 = vmatmul.mubr.msk.f32.vlgmr.msra.gmra.mrb[4].mxu0 %vm413_vm2, %v190_v29  ;;  %4443 = vmatpush3.xpose.msk.msra.mxu1 %vm413_vm2, %v388_v42 }
 0x1ac   :  { %4444 = vmatprep.mubr.msk.f32.mxu1 %vm4997_vm1, %v4996_v14  ;;  %4452 = vmatprep.subr.mxu1 %v4996_v14 }
 0x1ad   :  { %v392_v43 = vpop.permute.xlu1 %391  ;;  %4449 = vmatprep.mubr.msk.f32.mxu0 %vm4997_vm1, %v4996_v14 }
 0x1ae   :  { %v390_v44 = vpop.permute.xlu0 %389  ;;  %4445 = vmatmul.mubr.msk.f32.vlgmr.msra.gmra.mrb[10].mxu1 %vm413_vm2, %v374_v41 }
 0x1af   :  { %4448 = vmatpush3.xpose.msk.msra.mxu0 %vm413_vm2, %v390_v44  ;;  %4453 = vmatpush3.xpose.msk.msra.mxu1 %vm413_vm2, %v392_v43 }
 0x1b0   :  { %4454 = vmatprep.mubr.msk.f32.mxu1 %vm4997_vm1, %v4996_v14  ;;  %4457 = vmatprep.subr.mxu0 %v4996_v14 }
 0x1b1   :  { %v378_v46 = vpop.permute.xlu1 %377  ;;  %4462 = vmatprep.subr.mxu1 %v4996_v14 }
 0x1b2   :  { %v376_v47 = vpop.permute.xlu0 %375  ;;  %4455 = vmatmul.mubr.msk.f32.vlgmr.msra.gmra.mrb[12].mxu1 %vm413_vm2, %v378_v46 }
 0x1b3   :  { %4450 = vmatmul.mubr.msk.f32.vlgmr.msra.gmra.mrb[6].mxu0 %vm413_vm2, %v376_v47  ;;  %4464 = vmatprep.mubr.msk.f32.mxu1 %vm4997_vm1, %v4996_v14 }
 0x1b4   :  { %4458 = vmatpush3.msra.mxu0 %v357_v45  ;;  %4459 = vmatprep.mubr.msk.f32.mxu0 %vm4997_vm1, %v4996_v14 }
 0x1b5   :  { %4467 = vmatprep.subr.mxu0 %v4996_v14 }
 0x205   :  { %v484_v48 = vpop.f32.mrb[4].mxu1 }
 0x206   :  { %v1006_v49 = vmul.f32 0.35355338, %v484_v48  ;;  %v4421_v50 = vpop.f32.mrb[5].mxu1 }
 0x208   :  { %v1014_v51 = vsel %vm413_vm2, %v1006_v49, -inf }
 0x209   :  { %1015 = vmax.xlane.f32.xlu0 %v1014_v51 }
 0x279   :  { %v558_v52 = vpop.f32.mrb[6].mxu1 }
 0x27a   :  { %v1007_v53 = vmul.f32 0.35355338, %v558_v52  ;;  %v4426_v54 = vpop.f32.mrb[7].mxu1  ;;  %v632_v55 = vpop.f32.mrb[2].mxu0 }
 0x27b   :  { %v1008_v56 = vmul.f32 0.35355338, %v632_v55  ;;  %v4431_v57 = vpop.f32.mrb[3].mxu0 }
 0x27c   :  { %v1017_v58 = vsel %vm413_vm2, %v1007_v53, -inf }
 0x27d   :  { %1018 = vmax.xlane.f32.xlu1 %v1017_v58  ;;  %v706_v59 = vpop.f32.mrb[8].mxu1  ;;  %v1020_v60 = vsel %vm413_vm2, %v1008_v56, -inf }
 0x27e   :  { %v1009_v61 = vmul.f32 0.35355338, %v706_v59  ;;  %v780_v62 = vpop.f32.mrb[4].mxu0  ;;  %1021 = vmax.xlane.f32.xlu0 %v1020_v60  ;;  %v4436_v63 = vpop.f32.mrb[9].mxu1 }
 0x27f   :  { %v1010_v0 = vmul.f32 0.35355338, %v780_v62  ;;  %v4441_v1 = vpop.f32.mrb[5].mxu0 }
 0x280   :  { %v1023_v2 = vsel %vm413_vm2, %v1009_v61, -inf }
 0x281   :  { %v854_v3 = vpop.f32.mrb[10].mxu1  ;;  %v1026_v4 = vsel %vm413_vm2, %v1010_v0, -inf }
 0x282   :  { %v1011_v6 = vmul.f32 0.35355338, %v854_v3  ;;  %1027 = vmax.xlane.f32.xlu1 %v1026_v4  ;;  %1024 = vmax.xlane.f32.xlu0 %v1023_v2  ;;  %v4446_v7 = vpop.f32.mrb[11].mxu1 }
 0x284   :  { %v1029_v8 = vsel %vm413_vm2, %v1011_v6, -inf }
 0x285   :  { %v1002_v9 = vpop.f32.mrb[12].mxu1 }
 0x286   :  { %v928_v10 = vpop.f32.mrb[6].mxu0  ;;  %1030 = vmax.xlane.f32.xlu0 %v1029_v8  ;;  %v1013_v11 = vmul.f32 0.35355338, %v1002_v9  ;;  %v4456_v13 = vpop.f32.mrb[13].mxu1 }
 0x287   :  { %v1012_v15 = vmul.f32 0.35355338, %v928_v10  ;;  %v4451_v16 = vpop.f32.mrb[7].mxu0 }
 0x288   :  { %v1035_v17 = vsel %vm413_vm2, %v1013_v11, -inf }
 0x289   :  { %v1032_v18 = vsel %vm413_vm2, %v1012_v15, -inf }
 0x28a   :  { %1033 = vmax.xlane.f32.xlu1 %v1032_v18  ;;  %1036 = vmax.xlane.f32.xlu0 %v1035_v17 }
 0x296   :  { %v1016_v19 = vpop.xlane.xlu0 %1015 }
 0x297   :  { %v1038_v20 = vsub.f32 %v1006_v49, %v1016_v19 }
 0x299   :  { %v1046_v21 = vmul.f32 1.442695, %v1038_v20 }
 0x29b   :  { %394 = vrot.lane.b32.xlu1 %v357_v45, %s4999_s29  ;;  %4817 = vpow2.f32 %v1046_v21 }
 0x29f   :  { %400 = vrot.lane.b32.xlu1 %v357_v45, %s4998_s27 }
 0x2a0   :  { %397 = vrot.lane.b32.xlu0 %v357_v45, %s5000_s26 }
 0x2a3   :  { %404 = vrot.lane.b32.xlu1 %v5230_v35, %s4999_s29 }
 0x2a5   :  { %v4818_v22 = vpop.eup %4817 }
 0x2a6   :  { %v1062_v23 = vsel %vm413_vm2, %v4818_v22, 0.0 }
 0x2c7   :  { %1063 = vadd.xlane.f32.xlu1 %v1062_v23 }
 0x30a   :  { %v1019_v24 = vpop.xlane.xlu1 %1018 }
 0x30b   :  { %v1039_v25 = vsub.f32 %v1007_v53, %v1019_v24  ;;  %v1022_v26 = vpop.xlane.xlu0 %1021 }
 0x30c   :  { %v1040_v27 = vsub.f32 %v1008_v56, %v1022_v26 }
 0x30d   :  { %v1048_v28 = vmul.f32 1.442695, %v1039_v25 }
 0x30e   :  { %v1050_v29 = vmul.f32 1.442695, %v1040_v27 }
 0x30f   :  { %4819 = vpow2.f32 %v1048_v28  ;;  %v1028_v30 = vpop.xlane.xlu1 %1027  ;;  %v1025_v31 = vpop.xlane.xlu0 %1024 }
 0x310   :  { %4821 = vpow2.f32 %v1050_v29  ;;  %v1042_v32 = vsub.f32 %v1010_v0, %v1028_v30  ;;  %v1041_v33 = vsub.f32 %v1009_v61, %v1025_v31  ;;  %v1718_v30 = vld [vmem:[#allocation5] sm:$0xff]  ;;  %v1719_v31 = vld [vmem:[#allocation5 + $0x8] sm:$0xff] }
 0x312   :  { %v1054_v34 = vmul.f32 1.442695, %v1042_v32  ;;  %v1052_v36 = vmul.f32 1.442695, %v1041_v33  ;;  %v4716_v32 = vpack.c.bf16 %v1719_v31, %v1718_v30  ;;  %v1720_v33 = vld [vmem:[#allocation5 + $0x10] sm:$0xff]  ;;  %v1956_v31 = vld [vmem:[%s5682_s15 + $0x28] sm:$0xff] }
 0x313   :  { %v1031_v37 = vpop.xlane.xlu0 %1030  ;;  %v1955_v30 = vld [vmem:[%s5682_s15 + $0x20] sm:$0xff] }
 0x314   :  { %4823 = vpow2.f32 %v1054_v34  ;;  %v1043_v38 = vsub.f32 %v1011_v6, %v1031_v37  ;;  %v1721_v34 = vld [vmem:[#allocation5 + $0x18] sm:$0xff] }
 0x315   :  { %4825 = vpow2.f32 %v1052_v36  ;;  %v4720_v36 = vpack.c.bf16 %v1721_v34, %v1720_v33 }
 0x316   :  { %v1056_v39 = vmul.f32 1.442695, %v1043_v38 }
 0x317   :  { %v1034_v40 = vpop.xlane.xlu1 %1033  ;;  %v1037_v41 = vpop.xlane.xlu0 %1036 }
 0x318   :  { %4827 = vpow2.f32 %v1056_v39  ;;  %v1044_v42 = vsub.f32 %v1012_v15, %v1034_v40  ;;  %v1045_v43 = vsub.f32 %v1013_v11, %v1037_v41 }
 0x319   :  { %v4820_v44 = vpop.eup %4819 }
 0x31a   :  { %v4822_v45 = vpop.eup %4821  ;;  %v1058_v46 = vmul.f32 1.442695, %v1044_v42  ;;  %v1060_v47 = vmul.f32 1.442695, %v1045_v43  ;;  %v1065_v48 = vsel %vm413_vm2, %v4820_v44, 0.0 }
 0x31b   :  { %v395_v49 = vpop.permute.xlu1 %394  ;;  %1066 = vadd.xlane.f32.xlu0 %v1065_v48  ;;  %v1068_v50 = vsel %vm413_vm2, %v4822_v45, 0.0  ;;  %v398_v2 = vpop.permute.xlu0 %397 }
 0x31c   :  { %4829 = vpow2.f32 %v1058_v46  ;;  %1069 = vadd.xlane.f32.xlu1 %v1068_v50  ;;  %4463 = vmatpush3.msra.mxu1 %v395_v49 }
 0x31d   :  { %4831 = vpow2.f32 %v1060_v47  ;;  %4472 = vmatprep.subr.mxu1 %v4996_v14 }
 0x31e   :  { %v4824_v51 = vpop.eup %4823 }
 0x31f   :  { %v4826_v52 = vpop.eup %4825  ;;  %v1074_v53 = vsel %vm413_vm2, %v4824_v51, 0.0  ;;  %v401_v61 = vpop.permute.xlu1 %400 }
 0x320   :  { %1075 = vadd.xlane.f32.xlu1 %v1074_v53  ;;  %v1071_v54 = vsel %vm413_vm2, %v4826_v52, 0.0 }
 0x321   :  { %1072 = vadd.xlane.f32.xlu0 %v1071_v54 }
 0x322   :  { %v4828_v55 = vpop.eup %4827 }
 0x323   :  { %v1077_v56 = vsel %vm413_vm2, %v4828_v55, 0.0  ;;  %v405_v62 = vpop.permute.xlu1 %404 }
 0x325   :  { %1078 = vadd.xlane.f32.xlu0 %v1077_v56 }
 0x326   :  { %v5288_v57 = vpop.eup %4829 }
 0x327   :  { %v5290_v58 = vpop.eup %4831  ;;  %v1080_v59 = vsel %vm413_vm2, %v5288_v57, 0.0 }
 0x328   :  { %1081 = vadd.xlane.f32.xlu1 %v1080_v59  ;;  %v1083_v60 = vsel %vm413_vm2, %v5290_v58, 0.0 }
 0x329   :  { %1084 = vadd.xlane.f32.xlu0 %v1083_v60 }
 0x339   :  { %410 = vrot.lane.b32.xlu1 %v5230_v35, %s4998_s27 }
 0x33f   :  { %407 = vrot.lane.b32.xlu0 %v5230_v35, %s5000_s26 }
 0x354   :  { %v1064_v63 = vpop.xlane.xlu1 %1063 }
 0x355   :  { %4833 = vrcp.f32 %v1064_v63  ;;  %v4151_v63 = vld [vmem:[%s5675_s8] ss:$0 sm:$0xff] }
 0x35f   :  { %v4834_v0 = vpop.eup %4833 }
 0x360   :  { %v1094_v1 = vmul.f32 %v4834_v0, %v4818_v22 }
 0x362   :  { %4460 = vmatmul.mubr.msk.f32.vlgmr.msra.gmra.mrb[8].mxu0 %vm413_vm2, %v1094_v1 }
 0x363   :  { %4468 = vmatpush3.msra.mxu0 %v398_v2  ;;  %4469 = vmatprep.mubr.msk.f32.mxu0 %vm4997_vm1, %v4996_v14 }
 0x364   :  { %4477 = vmatprep.subr.mxu0 %v4996_v14 }
 0x3a8   :  { %v1067_v3 = vpop.xlane.xlu0 %1066 }
 0x3a9   :  { %4835 = vrcp.f32 %v1067_v3  ;;  %v1070_v4 = vpop.xlane.xlu1 %1069 }
 0x3aa   :  { %4837 = vrcp.f32 %v1070_v4 }
 0x3ad   :  { %v1076_v6 = vpop.xlane.xlu1 %1075 }
 0x3ae   :  { %4839 = vrcp.f32 %v1076_v6  ;;  %v1073_v7 = vpop.xlane.xlu0 %1072 }
 0x3af   :  { %4841 = vrcp.f32 %v1073_v7 }
 0x3b2   :  { %v1079_v8 = vpop.xlane.xlu0 %1078 }
 0x3b3   :  { %v4836_v9 = vpop.eup %4835  ;;  %4843 = vrcp.f32 %v1079_v8 }
 0x3b4   :  { %v4838_v10 = vpop.eup %4837  ;;  %v1095_v11 = vmul.f32 %v4836_v9, %v4820_v44 }
 0x3b5   :  { %v1096_v13 = vmul.f32 %v4838_v10, %v4822_v45  ;;  %v1082_v15 = vpop.xlane.xlu1 %1081 }
 0x3b6   :  { %4845 = vrcp.f32 %v1082_v15  ;;  %v1085_v16 = vpop.xlane.xlu0 %1084  ;;  %4465 = vmatmul.mubr.msk.f32.vlgmr.msra.gmra.mrb[14].mxu1 %vm413_vm2, %v1095_v11 }
 0x3b7   :  { %4847 = vrcp.f32 %v1085_v16  ;;  %4473 = vmatpush3.msra.mxu1 %v401_v61  ;;  %4470 = vmatmul.mubr.msk.f32.vlgmr.msra.gmra.mrb[10].mxu0 %vm413_vm2, %v1096_v13 }
 0x3b8   :  { %v4840_v17 = vpop.eup %4839  ;;  %4478 = vmatpush3.msra.mxu0 %v5230_v35  ;;  %4474 = vmatprep.mubr.msk.f32.mxu1 %vm4997_vm1, %v4996_v14 }
 0x3b9   :  { %v4842_v18 = vpop.eup %4841  ;;  %v1098_v19 = vmul.f32 %v4840_v17, %v4824_v51  ;;  %4479 = vmatprep.mubr.msk.f32.mxu0 %vm4997_vm1, %v4996_v14  ;;  %4482 = vmatprep.subr.mxu1 %v4996_v14  ;;  %v411_v24 = vpop.permute.xlu1 %410 }
 0x3ba   :  { %v1097_v20 = vmul.f32 %v4842_v18, %v4826_v52  ;;  %v408_v21 = vpop.permute.xlu0 %407  ;;  %4487 = vmatprep.subr.mxu0 %v4996_v14 }
 0x3bb   :  { %4480 = vmatmul.mubr.msk.f32.vlgmr.msra.gmra.mrb[12].mxu0 %vm413_vm2, %v1098_v19 }
 0x3bc   :  { %4475 = vmatmul.mubr.msk.f32.vlgmr.msra.gmra.mrb[16].mxu1 %vm413_vm2, %v1097_v20  ;;  %4488 = vmatpush3.msra.mxu0 %v408_v21  ;;  %v1858_v20 = vld [vmem:[#allocation7 + $0x8] sm:$0xff] }
 0x3bd   :  { %v4844_v35 = vpop.eup %4843  ;;  %4483 = vmatpush3.msra.mxu1 %v405_v62  ;;  %4484 = vmatprep.mubr.msk.f32.mxu1 %vm4997_vm1, %v4996_v14 }
 0x3be   :  { %v1099_v22 = vmul.f32 %v4844_v35, %v4828_v55  ;;  %4492 = vmatprep.subr.mxu1 %v4996_v14  ;;  %4489 = vmatprep.mubr.msk.f32.mxu0 %vm4997_vm1, %v4996_v14  ;;  %v1859_v35 = vld [vmem:[#allocation7 + $0x10] sm:$0xff] }
 0x3bf   :  { %4717 = vmatprep.subr.bf16.mxu0 %v4716_v32 }
 0x3c0   :  { %v4846_v23 = vpop.eup %4845  ;;  %4485 = vmatmul.mubr.msk.f32.vlgmr.msra.gmra.mrb[18].mxu1 %vm413_vm2, %v1099_v22  ;;  %v1860_v22 = vld [vmem:[#allocation7 + $0x18] sm:$0xff] }
 0x3c1   :  { %v4848_v25 = vpop.eup %4847  ;;  %v1100_v26 = vmul.f32 %v4846_v23, %v5288_v57  ;;  %4493 = vmatpush3.msra.mxu1 %v411_v24  ;;  %4494 = vmatprep.mubr.msk.f32.mxu1 %vm4997_vm1, %v4996_v14  ;;  %v4728_v23 = vpack.c.bf16 %v1860_v22, %v1859_v35  ;;  %v1951_v24 = vld [vmem:[%s5682_s15] sm:$0xff]  ;;  %v4166_v35 = vld [vmem:[%s5691_s23 + $0x30] sm:$0xff]  ;;  %v4167_v22 = vld [vmem:[%s5691_s23 + $0x38] sm:$0xff] }
 0x3c2   :  { %v1101_v27 = vmul.f32 %v4848_v25, %v5290_v58  ;;  %v1952_v25 = vld [vmem:[%s5682_s15 + $0x8] sm:$0xff] }
 0x3c3   :  { %4490 = vmatmul.mubr.msk.f32.vlgmr.msra.gmra.mrb[14].mxu0 %vm413_vm2, %v1100_v26  ;;  %v1953_v26 = vld [vmem:[%s5682_s15 + $0x10] sm:$0xff] }
 0x3c4   :  { %4495 = vmatmul.mubr.msk.f32.vlgmr.msra.gmra.mrb[20].mxu1 %vm413_vm2, %v1101_v27  ;;  %4719 = vmatpush3.bf16.msra.mxu0 %v4716_v32  ;;  %v4732_v27 = vpack.c.bf16 %v1952_v25, %v1951_v24  ;;  %v4740_v32 = vpack.c.bf16 %v1956_v31, %v1955_v30  ;;  %v4752_v24 = vpack.c.bf16 %v4167_v22, %v4166_v35  ;;  %v4183_v25 = vld [vmem:[%s5670_s3 + $0x38] sm:$0xff] }
 0x3c5   :  { %4721 = vmatprep.subr.bf16.mxu0 %v4720_v36 }
 0x3c8   :  { %4723 = vmatpush3.bf16.msra.mxu0 %v4720_v36 }
 0x3c9   :  { %4733 = vmatprep.subr.bf16.mxu0 %v4732_v27 }
 0x435   :  { %v1171_v28 = vpop.f32.mrb[8].mxu0 }
 0x436   :  { %v4461_v29 = vpop.f32.mrb[9].mxu0 }
 0x489   :  { %v1244_v37 = vpop.f32.mrb[14].mxu1 }
 0x48a   :  { %v1317_v38 = vpop.f32.mrb[10].mxu0  ;;  %1687 = vrot.lane.b32.xlu0 %v1244_v37, %s4994_s22  ;;  %v4466_v39 = vpop.f32.mrb[15].mxu1 }
 0x48b   :  { %1691 = vrot.lane.b32.xlu1 %v1317_v38, %s5001_s30  ;;  %v4471_v40 = vpop.f32.mrb[11].mxu0 }
 0x48e   :  { %v1463_v41 = vpop.f32.mrb[12].mxu0 }
 0x48f   :  { %v1390_v42 = vpop.f32.mrb[16].mxu1  ;;  %v4481_v43 = vpop.f32.mrb[13].mxu0 }
 0x490   :  { %1695 = vrot.lane.b32.xlu1 %v1390_v42, %s5002_s18  ;;  %v4476_v44 = vpop.f32.mrb[17].mxu1  ;;  %v4155_v43 = vld [vmem:[%s5677_s10] ss:$0 sm:$0xff] }
 0x493   :  { %v1536_v45 = vpop.f32.mrb[18].mxu1 }
 0x494   :  { %1704 = vrot.lane.b32.xlu0 %v1536_v45, %s4994_s22  ;;  %v4486_v46 = vpop.f32.mrb[19].mxu1 }
 0x496   :  { %v1609_v47 = vpop.f32.mrb[14].mxu0 }
 0x497   :  { %v1682_v48 = vpop.f32.mrb[20].mxu1  ;;  %v4491_v49 = vpop.f32.mrb[15].mxu0 }
 0x498   :  { %1708 = vrot.lane.b32.xlu0 %v1609_v47, %s5001_s30  ;;  %1712 = vrot.lane.b32.xlu1 %v1682_v48, %s5002_s18  ;;  %v4496_v50 = vpop.f32.mrb[21].mxu1 }
 0x499   :  { %v1957_v50 = vld [vmem:[%s5682_s15 + $0x30] sm:$0xff] }
 0x4fc   :  { %v1688_v51 = vpop.permute.xlu0 %1687 }
 0x4fd   :  { %v1692_v52 = vpop.permute.xlu1 %1691  ;;  %v1698_v53 = vsel %vm413_vm2, %v1171_v28, %v1688_v51  ;;  %v1954_v28 = vld [vmem:[%s5682_s15 + $0x18] sm:$0xff] }
 0x4fe   :  { %v1700_v54 = vsel %vm1699_vm3, %v1698_v53, %v1692_v52  ;;  %v4736_v29 = vpack.c.bf16 %v1954_v28, %v1953_v26  ;;  %v1958_v51 = vld [vmem:[%s5682_s15 + $0x38] sm:$0xff]  ;;  %v4156_v53 = vld [vmem:[%s5681_s14] ss:$0 sm:$0xff]  ;;  %v4173_v28 = vld [vmem:[%s5669_s2 + $0x28] sm:$0xff] }
 0x4ff   :  { %v4744_v52 = vpack.c.bf16 %v1958_v51, %v1957_v50  ;;  %v4185_v50 = vld [vmem:[%s5673_s6 + $0x1] ss:$0 sm:$0xff] }
 0x500   :  { %v4169_v51 = vld [vmem:[%s5671_s4 + $0x1] ss:$0 sm:$0xff] }
 0x502   :  { %v1696_v55 = vpop.permute.xlu1 %1695 }
 0x503   :  { %v1702_v56 = vsel %vm1701_vm4, %v1700_v54, %v1696_v55 }
 0x504   :  { %4505 = vmatprep.mubr.msk.f32.mxu0 %vm111_vm0, %v1702_v56 }
 0x506   :  { %v1705_v57 = vpop.permute.xlu0 %1704 }
 0x507   :  { %v1715_v58 = vsel %vm413_vm2, %v1463_v41, %v1705_v57  ;;  %v4154_v41 = vld [vmem:[%s5676_s9] ss:$0 sm:$0xff] }
 0x50a   :  { %v1709_v59 = vpop.permute.xlu0 %1708  ;;  %v1713_v60 = vpop.permute.xlu1 %1712 }
 0x50b   :  { %v1716_v61 = vsel %vm1699_vm3, %v1715_v58, %v1709_v59 }
 0x50c   :  { %v1717_v62 = vsel %vm1701_vm4, %v1716_v61, %v1713_v60  ;;  %v4159_v60 = vld [vmem:[%s5683_s16] ss:$0 sm:$0xff] }
 0x50d   :  { %4506 = vmatmul.mubr.msk.f32.vlgmr.msra.gmra.mrb[16].mxu0 %vm111_vm0, %v1717_v62 }
 0x50e   :  { %4735 = vmatpush3.bf16.msra.mxu0 %v4732_v27  ;;  %v4172_v27 = vld [vmem:[%s5669_s2 + $0x20] sm:$0xff] }
 0x50f   :  { %4737 = vmatprep.subr.bf16.mxu0 %v4736_v29 }
 0x512   :  { %4739 = vmatpush3.bf16.msra.mxu0 %v4736_v29  ;;  %v4756_v29 = vpack.c.bf16 %v4173_v28, %v4172_v27 }
 0x513   :  { %4741 = vmatprep.subr.bf16.mxu0 %v4740_v32 }
 0x516   :  { %4743 = vmatpush3.bf16.msra.mxu0 %v4740_v32 }
 0x517   :  { %4745 = vmatprep.subr.bf16.mxu0 %v4744_v52 }
 0x51a   :  { %4747 = vmatpush3.bf16.msra.mxu0 %v4744_v52 }
 0x5e0   :  { %v4507_v0 = vpop.f32.mrb[16].mxu0 }
 0x5e1   :  { %v1807_v1 = vadd.f32 %v4507_v0, %v4151_v63  ;;  %v1801_v2 = vpop.f32.mrb[17].mxu0 }
 0x5e2   :  { %v1802_v3 = vadd.f32 %v4151_v63, %v1801_v2 }
 0x5e3   :  { %v1811_v4 = vadd.f32 %v1807_v1, %v5176_v12 }
 0x5e4   :  { %v1810_v6 = vadd.f32 %v1802_v3, %v5158_v5  ;;  %v1857_v5 = vld [vmem:[#allocation7] sm:$0xff] }
 0x5e5   :  { %v1817_v7 = vsel %vm111_vm0, %v1811_v4, 0.0  ;;  %v4724_v21 = vpack.c.bf16 %v1858_v20, %v1857_v5  ;;  %v4180_v5 = vld [vmem:[%s5670_s3 + $0x20] sm:$0xff]  ;;  %v4181_v20 = vld [vmem:[%s5670_s3 + $0x28] sm:$0xff] }
 0x5e6   :  { %1818 = vadd.xlane.f32.xlu1 %v1817_v7  ;;  %v1814_v8 = vsel %vm111_vm0, %v1810_v6, 0.0 }
 0x5e7   :  { %1815 = vadd.xlane.f32.xlu0 %v1814_v8  ;;  %4725 = vmatprep.subr.bf16.mxu1 %v4724_v21 }
 0x5e8   :  { %4727 = vmatpush3.bf16.msra.mxu1 %v4724_v21  ;;  %v4764_v21 = vpack.c.bf16 %v4181_v20, %v4180_v5 }
 0x5e9   :  { %4729 = vmatprep.subr.bf16.mxu1 %v4728_v23 }
 0x5ea   :  { %4765 = vmatprep.subr.bf16.mxu0 %v4764_v21 }
 0x5ec   :  { %4731 = vmatpush3.bf16.msra.mxu1 %v4728_v23  ;;  %v4182_v23 = vld [vmem:[%s5670_s3 + $0x30] sm:$0xff] }
 0x5ed   :  { %v4768_v26 = vpack.c.bf16 %v4183_v25, %v4182_v23 }
 0x673   :  { %v1819_v9 = vpop.xlane.xlu1 %1818 }
 0x674   :  { %v1822_v10 = vmul.f32 0.03125, %v1819_v9  ;;  %v1816_v11 = vpop.xlane.xlu0 %1815 }
 0x675   :  { %v1821_v13 = vmul.f32 0.03125, %v1816_v11 }
 0x676   :  { %v1824_v15 = vsub.f32 %v1811_v4, %v1822_v10 }
 0x677   :  { %v1823_v16 = vsub.f32 %v1810_v6, %v1821_v13 }
 0x678   :  { %v1826_v19 = vmul.f32 %v1824_v15, %v1824_v15 }
 0x679   :  { %v1825_v17 = vmul.f32 %v1823_v16, %v1823_v16 }
 0x67a   :  { %v1830_v12 = vsel %vm111_vm0, %v1826_v19, 0.0  ;;  %v4165_v19 = vld [vmem:[%s5691_s23 + $0x28] sm:$0xff] }
 0x67b   :  { %v1827_v18 = vsel %vm111_vm0, %v1825_v17, 0.0 }
 0x67c   :  { %1828 = vadd.xlane.f32.xlu0 %v1827_v18  ;;  %v4164_v18 = vld [vmem:[%s5691_s23 + $0x20] sm:$0xff] }
 0x680   :  { %1831 = vadd.xlane.f32.xlu0 %v1830_v12  ;;  %v4748_v12 = vpack.c.bf16 %v4165_v19, %v4164_v18 }
 0x682   :  { %4749 = vmatprep.subr.bf16.mxu1 %v4748_v12 }
 0x709   :  { %v1829_v33 = vpop.xlane.xlu0 %1828 }
 0x70a   :  { %v1833_v34 = vmul.f32 0.03125, %v1829_v33 }
 0x70c   :  { %v1835_v36 = vadd.f32 1e-05, %v1833_v34 }
 0x70d   :  { %v1832_v37 = vpop.xlane.xlu0 %1831 }
 0x70e   :  { %4849 = vrsqrt.f32 %v1835_v36  ;;  %v1834_v38 = vmul.f32 0.03125, %v1832_v37 }
 0x710   :  { %v1836_v39 = vadd.f32 1e-05, %v1834_v38  ;;  %v4162_v38 = vld [vmem:[%s5678_s11] ss:$0 sm:$0xff] }
 0x712   :  { %4851 = vrsqrt.f32 %v1836_v39 }
 0x718   :  { %v4850_v40 = vpop.eup %4849 }
 0x719   :  { %v1839_v42 = vmul.f32 %v4850_v40, %v1823_v16 }
 0x71b   :  { %v1847_v44 = vmul.f32 %v4154_v41, %v1839_v42  ;;  %v4163_v42 = vld [vmem:[%s5679_s12] ss:$0 sm:$0xff] }
 0x71c   :  { %v4852_v45 = vpop.eup %4851 }
 0x71d   :  { %v1840_v46 = vmul.f32 %v4852_v45, %v1824_v15  ;;  %v1855_v47 = vadd.f32 %v4155_v43, %v1847_v44  ;;  %v4174_v45 = vld [vmem:[%s5669_s2 + $0x30] sm:$0xff] }
 0x71f   :  { %v1848_v48 = vmul.f32 %v4154_v41, %v1840_v46  ;;  %4516 = vmatprep.mubr.msk.f32.mxu1 %vm111_vm0, %v1855_v47  ;;  %v4175_v46 = vld [vmem:[%s5669_s2 + $0x38] sm:$0xff] }
 0x721   :  { %v1856_v49 = vadd.f32 %v4155_v43, %v1848_v48 }
 0x723   :  { %4517 = vmatmul.mubr.msk.f32.vlgmr.msra.gmra.mrb[22].mxu1 %vm111_vm0, %v1856_v49 }
 0x724   :  { %4751 = vmatpush3.bf16.msra.mxu1 %v4748_v12 }
 0x725   :  { %4753 = vmatprep.subr.bf16.mxu1 %v4752_v24 }
 0x728   :  { %4755 = vmatpush3.bf16.msra.mxu1 %v4752_v24 }
 0x729   :  { %4757 = vmatprep.subr.bf16.mxu1 %v4756_v29 }
 0x7f6   :  { %v4518_v54 = vpop.f32.mrb[22].mxu1 }
 0x7f7   :  { %v1946_v55 = vadd.f32 %v4518_v54, %v4156_v53  ;;  %v1940_v56 = vpop.f32.mrb[23].mxu1 }
 0x7f8   :  { %v1941_v57 = vadd.f32 %v4156_v53, %v1940_v56 }
 0x7f9   :  { %v1950_v59 = vmax.f32 %v1946_v55, 0.0 }
 0x7fa   :  { %v1949_v58 = vmax.f32 %v1941_v57, 0.0 }
 0x7fc   :  { %4535 = vmatprep.mubr.msk.f32.mxu0 %vm1966_vm5, %v1949_v58  ;;  %v4177_v58 = vld [vmem:[%s5672_s5 + $0x1] ss:$0 sm:$0xff] }
 0x7fd   :  { %4536 = vmatmul.mubr.msk.f32.vlgmr.msra.gmra.mrb[18].mxu0 %vm1966_vm5, %v1950_v59 }
 0x7fe   :  { %4767 = vmatpush3.bf16.msra.mxu0 %v4764_v21 }
 0x7ff   :  { %4769 = vmatprep.subr.bf16.mxu0 %v4768_v26 }
 0x802   :  { %4771 = vmatpush3.bf16.msra.mxu0 %v4768_v26 }
 0x803   :  { %4581 = vmatprep.subr.mxu0 %v4996_v14 }
 0x8d0   :  { %v4537_v61 = vpop.f32.mrb[18].mxu0 }
 0x8d1   :  { %v2045_v62 = vadd.f32 %v4537_v61, %v4159_v60  ;;  %v2039_v63 = vpop.f32.mrb[19].mxu0 }
 0x8d2   :  { %v2040_v0 = vadd.f32 %v4159_v60, %v2039_v63 }
 0x8d3   :  { %v2049_v1 = vadd.f32 %v2045_v62, %v1856_v49  ;;  %v4760_v49 = vpack.c.bf16 %v4175_v46, %v4174_v45 }
 0x8d4   :  { %v2048_v2 = vadd.f32 %v2040_v0, %v1855_v47 }
 0x8d5   :  { %v2055_v3 = vsel %vm111_vm0, %v2049_v1, 0.0 }
 0x8d6   :  { %2056 = vadd.xlane.f32.xlu0 %v2055_v3  ;;  %v2052_v4 = vsel %vm111_vm0, %v2048_v2, 0.0 }
 0x8d7   :  { %2053 = vadd.xlane.f32.xlu1 %v2052_v4 }
 0x963   :  { %v2057_v6 = vpop.xlane.xlu0 %2056 }
 0x964   :  { %v2059_v7 = vmul.f32 0.03125, %v2057_v6  ;;  %v2054_v8 = vpop.xlane.xlu1 %2053 }
 0x965   :  { %v2058_v9 = vmul.f32 0.03125, %v2054_v8 }
 0x966   :  { %v2061_v10 = vsub.f32 %v2049_v1, %v2059_v7 }
 0x967   :  { %v2060_v11 = vsub.f32 %v2048_v2, %v2058_v9 }
 0x968   :  { %v2063_v13 = vmul.f32 %v2061_v10, %v2061_v10 }
 0x969   :  { %v2062_v15 = vmul.f32 %v2060_v11, %v2060_v11 }
 0x96a   :  { %v2067_v16 = vsel %vm111_vm0, %v2063_v13, 0.0 }
 0x96b   :  { %2068 = vadd.xlane.f32.xlu0 %v2067_v16  ;;  %v2064_v17 = vsel %vm111_vm0, %v2062_v15, 0.0 }
 0x96c   :  { %2065 = vadd.xlane.f32.xlu1 %v2064_v17 }
 0x9f8   :  { %v2069_v30 = vpop.xlane.xlu0 %2068 }
 0x9f9   :  { %v2071_v31 = vmul.f32 0.03125, %v2069_v30  ;;  %v2066_v32 = vpop.xlane.xlu1 %2065 }
 0x9fa   :  { %v2070_v33 = vmul.f32 0.03125, %v2066_v32 }
 0x9fb   :  { %v2073_v34 = vadd.f32 1e-05, %v2071_v31 }
 0x9fc   :  { %v2072_v36 = vadd.f32 1e-05, %v2070_v33 }
 0x9fd   :  { %4853 = vrsqrt.f32 %v2073_v34 }
 0x9fe   :  { %4855 = vrsqrt.f32 %v2072_v36 }
 0xa07   :  { %v4854_v37 = vpop.eup %4853 }
 0xa08   :  { %v4856_v39 = vpop.eup %4855  ;;  %v2077_v40 = vmul.f32 %v4854_v37, %v2061_v10 }
 0xa09   :  { %v2076_v41 = vmul.f32 %v4856_v39, %v2060_v11 }
 0xa0a   :  { %v2085_v43 = vmul.f32 %v4162_v38, %v2077_v40 }
 0xa0b   :  { %v2084_v44 = vmul.f32 %v4162_v38, %v2076_v41 }
 0xa0c   :  { %v5439_v48 = vadd.f32 %v4163_v42, %v2085_v43 }
 0xa0d   :  { %v5437_v47 = vadd.f32 %v4163_v42, %v2084_v44 }
 0xa0f   :  { %4546 = vmatprep.mubr.msk.f32.mxu1 %vm111_vm0, %v5437_v47  ;;  %4568 = vmatprep.mubr.msk.f32.mxu0 %vm111_vm0, %v5437_v47 }
 0xa10   :  { %4547 = vmatmul.mubr.msk.f32.vlgmr.msra.gmra.mrb[24].mxu1 %vm111_vm0, %v5439_v48  ;;  %4569 = vmatmul.mubr.msk.f32.vlgmr.msra.gmra.mrb[20].mxu0 %vm111_vm0, %v5439_v48 }
 0xa11   :  { %4759 = vmatpush3.bf16.msra.mxu1 %v4756_v29  ;;  %4557 = vmatprep.mubr.msk.f32.mxu1 %vm111_vm0, %v5437_v47 }
 0xa12   :  { %4761 = vmatprep.subr.bf16.mxu1 %v4760_v49  ;;  %4583 = vmatprep.mubr.msk.f32.mxu0 %vm4997_vm1, %v4996_v14 }
 0xa15   :  { %4763 = vmatpush3.bf16.msra.mxu1 %v4760_v49 }
 0xa16   :  { %4571 = vmatprep.subr.mxu1 %v4996_v14 }
 0xa18   :  { %4558 = vmatmul.mubr.msk.f32.vlgmr.msra.gmra.mrb[26].mxu1 %vm111_vm0, %v5439_v48 }
 0xa19   :  { %4573 = vmatprep.mubr.msk.f32.mxu1 %vm4997_vm1, %v4996_v14 }
 0xae3   :  { %v4548_v52 = vpop.f32.mrb[24].mxu1  ;;  %v4570_v53 = vpop.f32.mrb[20].mxu0 }
 0xae4   :  { %v5464_v54 = vadd.f32 %v4570_v53, %v4185_v50  ;;  %v2179_v55 = vpop.f32.mrb[25].mxu1  ;;  %v2355_v56 = vpop.f32.mrb[21].mxu0  ;;  %v2185_v63 = vadd.f32 %v4548_v52, %v4169_v51 }
 0xae5   :  { %v2180_v57 = vadd.f32 %v4169_v51, %v2179_v55  ;;  %v2356_v10 = vadd.f32 %v4185_v50, %v2355_v56 }
 0xae7   :  { %2369 = vrot.lane.b32.xlu1 %v2180_v57, %s4998_s27  ;;  %2365 = vrot.lane.b32.xlu0 %v2180_v57, %s4999_s29 }
 0xaeb   :  { %v4559_v59 = vpop.f32.mrb[26].mxu1  ;;  %2367 = vrot.lane.b32.xlu0 %v2180_v57, %s5000_s26 }
 0xaec   :  { %v2267_v60 = vpop.f32.mrb[27].mxu1  ;;  %v2273_v62 = vadd.f32 %v4559_v59, %v4177_v58 }
 0xaed   :  { %v2268_v61 = vadd.f32 %v4177_v58, %v2267_v60 }
 0xaef   :  { %4572 = vmatpush3.xpose.msk.msra.mxu1 %vm413_vm2, %v2268_v61  ;;  %2379 = vrot.lane.b32.xlu1 %v2268_v61, %s4999_s29 }
 0xaf0   :  { %2386 = vrot.lane.b32.xlu0 %v2273_v62, %s4999_s29  ;;  %4576 = vmatprep.subr.mxu1 %v4996_v14 }
 0xaf2   :  { %4574 = vmatmul.mubr.msk.f32.vlgmr.msra.gmra.mrb[28].mxu1 %vm413_vm2, %v2180_v57 }
 0xaf3   :  { %2381 = vrot.lane.b32.xlu1 %v2268_v61, %s5000_s26  ;;  %4578 = vmatprep.mubr.msk.f32.mxu1 %vm4997_vm1, %v4996_v14 }
 0xaf4   :  { %2388 = vrot.lane.b32.xlu0 %v2273_v62, %s5000_s26 }
 0xaf7   :  { %2383 = vrot.lane.b32.xlu1 %v2268_v61, %s4998_s27 }
 0xaf8   :  { %2374 = vrot.lane.b32.xlu0 %v2185_v63, %s5000_s26 }
 0xafb   :  { %2372 = vrot.lane.b32.xlu1 %v2185_v63, %s4999_s29 }
 0xaff   :  { %2390 = vrot.lane.b32.xlu1 %v2273_v62, %s4998_s27 }
 0xb03   :  { %2376 = vrot.lane.b32.xlu1 %v2185_v63, %s4998_s27 }
 0xb59   :  { %v2366_v0 = vpop.permute.xlu0 %2365  ;;  %v2370_v1 = vpop.permute.xlu1 %2369 }
 0xb5d   :  { %v2368_v2 = vpop.permute.xlu0 %2367 }
 0xb61   :  { %v2380_v3 = vpop.permute.xlu1 %2379 }
 0xb62   :  { %4577 = vmatpush3.xpose.msk.msra.mxu1 %vm413_vm2, %v2380_v3  ;;  %v2387_v4 = vpop.permute.xlu0 %2386 }
 0xb63   :  { %4586 = vmatprep.subr.mxu1 %v4996_v14 }
 0xb65   :  { %v2382_v6 = vpop.permute.xlu1 %2381  ;;  %4579 = vmatmul.mubr.msk.f32.vlgmr.msra.gmra.mrb[30].mxu1 %vm413_vm2, %v2366_v0 }
 0xb66   :  { %4582 = vmatpush3.xpose.msk.msra.mxu0 %vm413_vm2, %v2382_v6  ;;  %4588 = vmatprep.mubr.msk.f32.mxu1 %vm4997_vm1, %v4996_v14  ;;  %v2389_v8 = vpop.permute.xlu0 %2388 }
 0xb67   :  { %4591 = vmatprep.subr.mxu0 %v4996_v14 }
 0xb69   :  { %v2384_v7 = vpop.permute.xlu1 %2383  ;;  %4584 = vmatmul.mubr.msk.f32.vlgmr.msra.gmra.mrb[22].mxu0 %vm413_vm2, %v2368_v2 }
 0xb6a   :  { %4592 = vmatpush3.xpose.msk.msra.mxu0 %vm413_vm2, %v2273_v62  ;;  %4587 = vmatpush3.xpose.msk.msra.mxu1 %vm413_vm2, %v2384_v7  ;;  %v2375_v11 = vpop.permute.xlu0 %2374 }
 0xb6b   :  { %4593 = vmatprep.mubr.msk.f32.mxu0 %vm4997_vm1, %v4996_v14  ;;  %4596 = vmatprep.subr.mxu1 %v4996_v14 }
 0xb6c   :  { %4601 = vmatprep.subr.mxu0 %v4996_v14 }
 0xb6d   :  { %v2373_v9 = vpop.permute.xlu1 %2372  ;;  %4589 = vmatmul.mubr.msk.f32.vlgmr.msra.gmra.mrb[32].mxu1 %vm413_vm2, %v2370_v1  ;;  %4594 = vmatmul.mubr.msk.f32.vlgmr.msra.gmra.mrb[24].mxu0 %vm413_vm2, %v2185_v63 }
 0xb6e   :  { %4597 = vmatpush3.xpose.msk.msra.mxu1 %vm413_vm2, %v2387_v4  ;;  %4602 = vmatpush3.xpose.msk.msra.mxu0 %vm413_vm2, %v2389_v8 }
 0xb6f   :  { %4598 = vmatprep.mubr.msk.f32.mxu1 %vm4997_vm1, %v4996_v14  ;;  %4603 = vmatprep.mubr.msk.f32.mxu0 %vm4997_vm1, %v4996_v14 }
 0xb70   :  { %4606 = vmatprep.subr.mxu1 %v4996_v14  ;;  %4611 = vmatprep.subr.mxu0 %v4996_v14 }
 0xb71   :  { %v2391_v13 = vpop.permute.xlu1 %2390  ;;  %4599 = vmatmul.mubr.msk.f32.vlgmr.msra.gmra.mrb[34].mxu1 %vm413_vm2, %v2373_v9  ;;  %4604 = vmatmul.mubr.msk.f32.vlgmr.msra.gmra.mrb[26].mxu0 %vm413_vm2, %v2375_v11 }
 0xb72   :  { %4607 = vmatpush3.xpose.msk.msra.mxu1 %vm413_vm2, %v2391_v13  ;;  %4612 = vmatpush3.msra.mxu0 %v2356_v10 }
 0xb73   :  { %4608 = vmatprep.mubr.msk.f32.mxu1 %vm4997_vm1, %v4996_v14  ;;  %4616 = vmatprep.subr.mxu1 %v4996_v14 }
 0xb74   :  { %4613 = vmatprep.mubr.msk.f32.mxu0 %vm4997_vm1, %v4996_v14  ;;  %4621 = vmatprep.subr.mxu0 %v4996_v14 }
 0xb75   :  { %v2377_v15 = vpop.permute.xlu1 %2376 }
 0xb76   :  { %4609 = vmatmul.mubr.msk.f32.vlgmr.msra.gmra.mrb[36].mxu1 %vm413_vm2, %v2377_v15 }
 0xb77   :  { %4618 = vmatprep.mubr.msk.f32.mxu1 %vm4997_vm1, %v4996_v14 }
 0xbc5   :  { %v2482_v16 = vpop.f32.mrb[28].mxu1 }
 0xbc6   :  { %v3004_v17 = vmul.f32 0.35355338, %v2482_v16  ;;  %v4575_v18 = vpop.f32.mrb[29].mxu1 }
 0xbc8   :  { %v3012_v19 = vsel %vm413_vm2, %v3004_v17, -inf }
 0xbc9   :  { %3013 = vmax.xlane.f32.xlu0 %v3012_v19 }
 0xc38   :  { %v2556_v12 = vpop.f32.mrb[30].mxu1 }
 0xc39   :  { %v3005_v5 = vmul.f32 0.35355338, %v2556_v12  ;;  %v4580_v20 = vpop.f32.mrb[31].mxu1 }
 0xc3b   :  { %v3015_v21 = vsel %vm413_vm2, %v3005_v5, -inf }
 0xc3c   :  { %v2630_v35 = vpop.f32.mrb[22].mxu0  ;;  %3016 = vmax.xlane.f32.xlu1 %v3015_v21 }
 0xc3d   :  { %v3006_v22 = vmul.f32 0.35355338, %v2630_v35  ;;  %v4585_v23 = vpop.f32.mrb[23].mxu0 }
 0xc3f   :  { %v3018_v24 = vsel %vm413_vm2, %v3006_v22, -inf }
 0xc40   :  { %v2778_v25 = vpop.f32.mrb[24].mxu0  ;;  %3019 = vmax.xlane.f32.xlu0 %v3018_v24  ;;  %v2704_v26 = vpop.f32.mrb[32].mxu1 }
 0xc41   :  { %v3008_v27 = vmul.f32 0.35355338, %v2778_v25  ;;  %v3007_v28 = vmul.f32 0.35355338, %v2704_v26  ;;  %v4590_v29 = vpop.f32.mrb[33].mxu1  ;;  %v4595_v30 = vpop.f32.mrb[25].mxu0 }
 0xc43   :  { %v3024_v31 = vsel %vm413_vm2, %v3008_v27, -inf  ;;  %v3021_v32 = vsel %vm413_vm2, %v3007_v28, -inf }
 0xc44   :  { %v2926_v33 = vpop.f32.mrb[26].mxu0  ;;  %3025 = vmax.xlane.f32.xlu1 %v3024_v31  ;;  %3022 = vmax.xlane.f32.xlu0 %v3021_v32  ;;  %v2852_v34 = vpop.f32.mrb[34].mxu1 }
 0xc45   :  { %v3010_v36 = vmul.f32 0.35355338, %v2926_v33  ;;  %v3009_v37 = vmul.f32 0.35355338, %v2852_v34  ;;  %v4600_v38 = vpop.f32.mrb[35].mxu1  ;;  %v4605_v39 = vpop.f32.mrb[27].mxu0 }
 0xc47   :  { %v3030_v40 = vsel %vm413_vm2, %v3010_v36, -inf  ;;  %v3027_v41 = vsel %vm413_vm2, %v3009_v37, -inf }
 0xc48   :  { %3031 = vmax.xlane.f32.xlu1 %v3030_v40  ;;  %3028 = vmax.xlane.f32.xlu0 %v3027_v41 }
 0xc49   :  { %v3000_v42 = vpop.f32.mrb[36].mxu1 }
 0xc4a   :  { %v3011_v43 = vmul.f32 0.35355338, %v3000_v42  ;;  %v4610_v44 = vpop.f32.mrb[37].mxu1 }
 0xc4c   :  { %v3033_v45 = vsel %vm413_vm2, %v3011_v43, -inf }
 0xc4d   :  { %3034 = vmax.xlane.f32.xlu0 %v3033_v45 }
 0xc56   :  { %v3014_v46 = vpop.xlane.xlu0 %3013 }
 0xc57   :  { %v3036_v49 = vsub.f32 %v3004_v17, %v3014_v46 }
 0xc59   :  { %2393 = vrot.lane.b32.xlu1 %v2356_v10, %s4999_s29  ;;  %v3044_v50 = vmul.f32 1.442695, %v3036_v49 }
 0xc5b   :  { %4857 = vpow2.f32 %v3044_v50 }
 0xc5d   :  { %2399 = vrot.lane.b32.xlu1 %v2356_v10, %s4998_s27 }
 0xc61   :  { %2403 = vrot.lane.b32.xlu1 %v5464_v54, %s4999_s29 }
 0xc63   :  { %2396 = vrot.lane.b32.xlu0 %v2356_v10, %s5000_s26 }
 0xc65   :  { %v4858_v51 = vpop.eup %4857 }
 0xc66   :  { %v3060_v52 = vsel %vm413_vm2, %v4858_v51, 0.0 }
 0xc85   :  { %3061 = vadd.xlane.f32.xlu1 %v3060_v52 }
 0xcc9   :  { %v3017_v53 = vpop.xlane.xlu1 %3016 }
 0xcca   :  { %v3037_v55 = vsub.f32 %v3005_v5, %v3017_v53 }
 0xccc   :  { %v3046_v56 = vmul.f32 1.442695, %v3037_v55 }
 0xccd   :  { %v3020_v57 = vpop.xlane.xlu0 %3019 }
 0xcce   :  { %4859 = vpow2.f32 %v3046_v56  ;;  %v3038_v58 = vsub.f32 %v3006_v22, %v3020_v57 }
 0xcd0   :  { %v3048_v59 = vmul.f32 1.442695, %v3038_v58 }
 0xcd1   :  { %v3026_v60 = vpop.xlane.xlu1 %3025  ;;  %v3023_v61 = vpop.xlane.xlu0 %3022 }
 0xcd2   :  { %4861 = vpow2.f32 %v3048_v59  ;;  %v3040_v62 = vsub.f32 %v3008_v27, %v3026_v60  ;;  %v3039_v63 = vsub.f32 %v3007_v28, %v3023_v61  ;;  %v3715_v60 = vld [vmem:[#allocation5 + $0x20] sm:$0xff]  ;;  %v3716_v61 = vld [vmem:[#allocation5 + $0x28] sm:$0xff] }
 0xcd4   :  { %v3052_v0 = vmul.f32 1.442695, %v3040_v62  ;;  %v3050_v1 = vmul.f32 1.442695, %v3039_v63  ;;  %v4772_v62 = vpack.c.bf16 %v3716_v61, %v3715_v60  ;;  %v4229_v60 = vld [vmem:[%s5682_s15 + $0x68] sm:$0xff] }
 0xcd5   :  { %v3032_v2 = vpop.xlane.xlu1 %3031  ;;  %v3029_v3 = vpop.xlane.xlu0 %3028 }
 0xcd6   :  { %4863 = vpow2.f32 %v3052_v0  ;;  %v3042_v4 = vsub.f32 %v3010_v36, %v3032_v2  ;;  %v3041_v6 = vsub.f32 %v3009_v37, %v3029_v3  ;;  %v3718_v2 = vld [vmem:[#allocation5 + $0x38] sm:$0xff] }
 0xcd7   :  { %4865 = vpow2.f32 %v3050_v1  ;;  %v3717_v1 = vld [vmem:[#allocation5 + $0x30] sm:$0xff] }
 0xcd8   :  { %v4860_v7 = vpop.eup %4859  ;;  %v3056_v8 = vmul.f32 1.442695, %v3042_v4  ;;  %v3054_v9 = vmul.f32 1.442695, %v3041_v6  ;;  %v4776_v3 = vpack.c.bf16 %v3718_v2, %v3717_v1 }
 0xcd9   :  { %v2394_v10 = vpop.permute.xlu1 %2393  ;;  %v3063_v11 = vsel %vm413_vm2, %v4860_v7, 0.0 }
 0xcda   :  { %4867 = vpow2.f32 %v3056_v8  ;;  %4617 = vmatpush3.msra.mxu1 %v2394_v10  ;;  %3064 = vadd.xlane.f32.xlu0 %v3063_v11  ;;  %v3035_v13 = vpop.xlane.xlu0 %3034 }
 0xcdb   :  { %4869 = vpow2.f32 %v3054_v9  ;;  %v3043_v15 = vsub.f32 %v3011_v43, %v3035_v13  ;;  %4626 = vmatprep.subr.mxu1 %v4996_v14 }
 0xcdc   :  { %v4862_v16 = vpop.eup %4861 }
 0xcdd   :  { %v3058_v17 = vmul.f32 1.442695, %v3043_v15  ;;  %v3066_v18 = vsel %vm413_vm2, %v4862_v16, 0.0  ;;  %v2400_v26 = vpop.permute.xlu1 %2399 }
 0xcde   :  { %3067 = vadd.xlane.f32.xlu1 %v3066_v18  ;;  %v2397_v31 = vpop.permute.xlu0 %2396 }
 0xcdf   :  { %4871 = vpow2.f32 %v3058_v17 }
 0xce0   :  { %v4864_v19 = vpop.eup %4863 }
 0xce1   :  { %v4866_v12 = vpop.eup %4865  ;;  %v3072_v5 = vsel %vm413_vm2, %v4864_v19, 0.0  ;;  %v2404_v27 = vpop.permute.xlu1 %2403 }
 0xce2   :  { %3073 = vadd.xlane.f32.xlu1 %v3072_v5  ;;  %v3069_v20 = vsel %vm413_vm2, %v4866_v12, 0.0 }
 0xce3   :  { %3070 = vadd.xlane.f32.xlu0 %v3069_v20 }
 0xce4   :  { %v4868_v21 = vpop.eup %4867 }
 0xce5   :  { %v4870_v35 = vpop.eup %4869  ;;  %v3078_v22 = vsel %vm413_vm2, %v4868_v21, 0.0 }
 0xce6   :  { %3079 = vadd.xlane.f32.xlu1 %v3078_v22  ;;  %v3075_v23 = vsel %vm413_vm2, %v4870_v35, 0.0 }
 0xce7   :  { %3076 = vadd.xlane.f32.xlu0 %v3075_v23 }
 0xce9   :  { %v5543_v24 = vpop.eup %4871 }
 0xcea   :  { %v3081_v25 = vsel %vm413_vm2, %v5543_v24, 0.0 }
 0xceb   :  { %3082 = vadd.xlane.f32.xlu0 %v3081_v25 }
 0xcf7   :  { %2409 = vrot.lane.b32.xlu1 %v5464_v54, %s4998_s27 }
 0xd01   :  { %2406 = vrot.lane.b32.xlu0 %v5464_v54, %s5000_s26 }
 0xd12   :  { %v3062_v28 = vpop.xlane.xlu1 %3061 }
 0xd13   :  { %4873 = vrcp.f32 %v3062_v28 }
 0xd1d   :  { %v4874_v29 = vpop.eup %4873 }
 0xd1e   :  { %v3092_v30 = vmul.f32 %v4874_v29, %v4858_v51 }
 0xd20   :  { %4614 = vmatmul.mubr.msk.f32.vlgmr.msra.gmra.mrb[28].mxu0 %vm413_vm2, %v3092_v30 }
 0xd21   :  { %4622 = vmatpush3.msra.mxu0 %v2397_v31  ;;  %4623 = vmatprep.mubr.msk.f32.mxu0 %vm4997_vm1, %v4996_v14 }
 0xd22   :  { %4631 = vmatprep.subr.mxu0 %v4996_v14 }
 0xd67   :  { %v3065_v32 = vpop.xlane.xlu0 %3064 }
 0xd68   :  { %4875 = vrcp.f32 %v3065_v32 }
 0xd6b   :  { %v3068_v33 = vpop.xlane.xlu1 %3067 }
 0xd6c   :  { %4877 = vrcp.f32 %v3068_v33 }
 0xd6f   :  { %v3074_v34 = vpop.xlane.xlu1 %3073 }
 0xd70   :  { %4879 = vrcp.f32 %v3074_v34  ;;  %v3071_v36 = vpop.xlane.xlu0 %3070 }
 0xd71   :  { %4881 = vrcp.f32 %v3071_v36 }
 0xd72   :  { %v4876_v37 = vpop.eup %4875 }
 0xd73   :  { %v3093_v38 = vmul.f32 %v4876_v37, %v4860_v7  ;;  %v3080_v39 = vpop.xlane.xlu1 %3079 }
 0xd74   :  { %4883 = vrcp.f32 %v3080_v39  ;;  %v3077_v40 = vpop.xlane.xlu0 %3076 }
 0xd75   :  { %4885 = vrcp.f32 %v3077_v40  ;;  %4619 = vmatmul.mubr.msk.f32.vlgmr.msra.gmra.mrb[38].mxu1 %vm413_vm2, %v3093_v38 }
 0xd76   :  { %v4878_v41 = vpop.eup %4877  ;;  %4627 = vmatpush3.msra.mxu1 %v2400_v26  ;;  %4628 = vmatprep.mubr.msk.f32.mxu1 %vm4997_vm1, %v4996_v14 }
 0xd77   :  { %v3094_v42 = vmul.f32 %v4878_v41, %v4862_v16  ;;  %4636 = vmatprep.subr.mxu1 %v4996_v14  ;;  %v2410_v55 = vpop.permute.xlu1 %2409 }
 0xd78   :  { %v3083_v43 = vpop.xlane.xlu0 %3082 }
 0xd79   :  { %4887 = vrcp.f32 %v3083_v43  ;;  %4624 = vmatmul.mubr.msk.f32.vlgmr.msra.gmra.mrb[30].mxu0 %vm413_vm2, %v3094_v42 }
 0xd7a   :  { %v4880_v44 = vpop.eup %4879  ;;  %4632 = vmatpush3.msra.mxu0 %v5464_v54  ;;  %4633 = vmatprep.mubr.msk.f32.mxu0 %vm4997_vm1, %v4996_v14 }
 0xd7b   :  { %v4882_v45 = vpop.eup %4881  ;;  %v3096_v46 = vmul.f32 %v4880_v44, %v4864_v19  ;;  %4641 = vmatprep.subr.mxu0 %v4996_v14 }
 0xd7c   :  { %v3095_v49 = vmul.f32 %v4882_v45, %v4866_v12  ;;  %v2407_v50 = vpop.permute.xlu0 %2406 }
 0xd7d   :  { %4634 = vmatmul.mubr.msk.f32.vlgmr.msra.gmra.mrb[32].mxu0 %vm413_vm2, %v3096_v46  ;;  %v3858_v46 = vld [vmem:[#allocation7 + $0x28] sm:$0xff] }
 0xd7e   :  { %v4884_v51 = vpop.eup %4883  ;;  %4629 = vmatmul.mubr.msk.f32.vlgmr.msra.gmra.mrb[40].mxu1 %vm413_vm2, %v3095_v49  ;;  %4642 = vmatpush3.msra.mxu0 %v2407_v50  ;;  %v3859_v50 = vld [vmem:[#allocation7 + $0x30] sm:$0xff] }
 0xd7f   :  { %v4886_v52 = vpop.eup %4885  ;;  %v3098_v53 = vmul.f32 %v4884_v51, %v4868_v21  ;;  %4637 = vmatpush3.msra.mxu1 %v2404_v27  ;;  %4638 = vmatprep.mubr.msk.f32.mxu1 %vm4997_vm1, %v4996_v14  ;;  %v4213_v27 = vld [vmem:[%s5675_s8 + $0x1] ss:$0 sm:$0xff]  ;;  %v3860_v51 = vld [vmem:[#allocation7 + $0x38] sm:$0xff]  ;;  %s5003_s8 = smov [#allocation8]  }
 0xd80   :  { %v3097_v54 = vmul.f32 %v4886_v52, %v4870_v35  ;;  %4643 = vmatprep.mubr.msk.f32.mxu0 %vm4997_vm1, %v4996_v14  ;;  %4646 = vmatprep.subr.mxu1 %v4996_v14  ;;  %v4784_v52 = vpack.c.bf16 %v3860_v51, %v3859_v50  ;;  %v4238_v50 = vld [vmem:[%s5678_s11 + $0x1] ss:$0 sm:$0xff]  ;;  %s4105_s27 = sshll.u32 %s5003_s8, 4  ;;  %s4106_s27 = int_to_ptr.vmem [resolvable:$true] %s4105_s27 }
 0xd81   :  { %4644 = vmatmul.mubr.msk.f32.vlgmr.msra.gmra.mrb[34].mxu0 %vm413_vm2, %v3098_v53  ;;  %4773 = vmatprep.subr.bf16.mxu0 %v4772_v62  ;;  %v4224_v53 = vld [vmem:[%s5682_s15 + $0x40] sm:$0xff]  ;;  %s4963_s29 = scalar_lea.vmem %s4106_s27, 256  ;;  %p4968_p11 = scmp.lt.s32.totalorder %s4106_s27, %s4106_s27 }
 0xd82   :  { %4639 = vmatmul.mubr.msk.f32.vlgmr.msra.gmra.mrb[42].mxu1 %vm413_vm2, %v3097_v54  ;;  %4775 = vmatpush3.bf16.msra.mxu0 %v4772_v62  ;;  %v4225_v54 = vld [vmem:[%s5682_s15 + $0x48] sm:$0xff]  ;;  %p4964_p10 = scmp.ne.s32.totalorder %s4106_s27, %s4963_s29  ;;  %p4969_p12 = scmp.lt.s32.totalorder %s4963_s29, %s4963_s29 }
 0xd83   :  { %v4888_v56 = vpop.eup %4887  ;;  %4647 = vmatpush3.msra.mxu1 %v2410_v55  ;;  %4648 = vmatprep.mubr.msk.f32.mxu1 %vm4997_vm1, %v4996_v14  ;;  %v4226_v55 = vld [vmem:[%s5682_s15 + $0x50] sm:$0xff] }
 0xd84   :  { %v3099_v57 = vmul.f32 %v4888_v56, %v5543_v24  ;;  %4777 = vmatprep.subr.bf16.mxu0 %v4776_v3  ;;  %v4788_v56 = vpack.c.bf16 %v4225_v54, %v4224_v53  ;;  %v4239_v54 = vld [vmem:[%s5679_s12 + $0x1] ss:$0 sm:$0xff]  ;;  %p4970_p13 = por %p4969_p12, %p4968_p11 }
 0xd86   :  { %4649 = vmatmul.mubr.msk.f32.vlgmr.msra.gmra.mrb[44].mxu1 %vm413_vm2, %v3099_v57  ;;  %4779 = vmatpush3.bf16.msra.mxu0 %v4776_v3  ;;  %v4227_v57 = vld [vmem:[%s5682_s15 + $0x58] sm:$0xff]  ;;  %p4971_p0 = pnand %p4970_p13, %p4964_p10 }
 0xd87   :  { %4789 = vmatprep.subr.bf16.mxu0 %v4788_v56 }
 0xdf3   :  { %v3169_v58 = vpop.f32.mrb[28].mxu0 }
 0xdf4   :  { %v4615_v59 = vpop.f32.mrb[29].mxu0 }
 0xdf5   :  { %v4228_v59 = vld [vmem:[%s5682_s15 + $0x60] sm:$0xff] }
 0xdf6   :  { %v4796_v61 = vpack.c.bf16 %v4229_v60, %v4228_v59 }
 0xe48   :  { %v3242_v63 = vpop.f32.mrb[38].mxu1 }
 0xe49   :  { %3685 = vrot.lane.b32.xlu0 %v3242_v63, %s4994_s22  ;;  %v4620_v0 = vpop.f32.mrb[39].mxu1 }
 0xe4c   :  { %v3315_v4 = vpop.f32.mrb[30].mxu0 }
 0xe4d   :  { %3689 = vrot.lane.b32.xlu1 %v3315_v4, %s5001_s30  ;;  %v4625_v14 = vpop.f32.mrb[31].mxu0 }
 0xe4e   :  { %v4218_v14 = vld [vmem:[%s5676_s9 + $0x1] ss:$0 sm:$0xff] }
 0xe50   :  { %v3461_v6 = vpop.f32.mrb[32].mxu0 }
 0xe51   :  { %v3388_v7 = vpop.f32.mrb[40].mxu1  ;;  %v4635_v8 = vpop.f32.mrb[33].mxu0 }
 0xe52   :  { %3693 = vrot.lane.b32.xlu1 %v3388_v7, %s5002_s18  ;;  %v4630_v9 = vpop.f32.mrb[41].mxu1  ;;  %v4219_v7 = vld [vmem:[%s5677_s10 + $0x1] ss:$0 sm:$0xff] }
 0xe54   :  { %v3607_v10 = vpop.f32.mrb[34].mxu0 }
 0xe55   :  { %v3534_v11 = vpop.f32.mrb[42].mxu1  ;;  %v4645_v13 = vpop.f32.mrb[35].mxu0 }
 0xe56   :  { %3700 = vrot.lane.b32.xlu0 %v3534_v11, %s4994_s22  ;;  %v4640_v15 = vpop.f32.mrb[43].mxu1 }
 0xe59   :  { %v3680_v16 = vpop.f32.mrb[44].mxu1 }
 0xe5a   :  { %3704 = vrot.lane.b32.xlu0 %v3607_v10, %s5001_s30  ;;  %3708 = vrot.lane.b32.xlu1 %v3680_v16, %s5002_s18  ;;  %v4650_v17 = vpop.f32.mrb[45].mxu1  ;;  %v4230_v16 = vld [vmem:[%s5682_s15 + $0x70] sm:$0xff] }
 0xe5b   :  { %v4231_v17 = vld [vmem:[%s5682_s15 + $0x78] sm:$0xff] }
 0xebb   :  { %v3686_v19 = vpop.permute.xlu0 %3685 }
 0xebc   :  { %v3696_v12 = vsel %vm413_vm2, %v3169_v58, %v3686_v19  ;;  %v4792_v58 = vpack.c.bf16 %v4227_v57, %v4226_v55  ;;  %v4221_v19 = vld [vmem:[%s5681_s14 + $0x1] ss:$0 sm:$0xff] }
 0xebf   :  { %v3690_v18 = vpop.permute.xlu1 %3689 }
 0xec0   :  { %v3697_v5 = vsel %vm1699_vm3, %v3696_v12, %v3690_v18  ;;  %v4800_v18 = vpack.c.bf16 %v4231_v17, %v4230_v16 }
 0xec4   :  { %v3694_v20 = vpop.permute.xlu1 %3693 }
 0xec5   :  { %v3698_v21 = vsel %vm1701_vm4, %v3697_v5, %v3694_v20 }
 0xec6   :  { %4659 = vmatprep.mubr.msk.f32.mxu0 %vm111_vm0, %v3698_v21 }
 0xec8   :  { %v3701_v35 = vpop.permute.xlu0 %3700 }
 0xec9   :  { %v3711_v22 = vsel %vm413_vm2, %v3461_v6, %v3701_v35 }
 0xecc   :  { %v3705_v23 = vpop.permute.xlu0 %3704  ;;  %v3709_v24 = vpop.permute.xlu1 %3708 }
 0xecd   :  { %v3712_v25 = vsel %vm1699_vm3, %v3711_v22, %v3705_v23  ;;  %v4233_v23 = vld [vmem:[%s5683_s16 + $0x1] ss:$0 sm:$0xff] }
 0xece   :  { %v3713_v26 = vsel %vm1701_vm4, %v3712_v25, %v3709_v24 }
 0xecf   :  { %4660 = vmatmul.mubr.msk.f32.vlgmr.msra.gmra.mrb[36].mxu0 %vm111_vm0, %v3713_v26 }
 0xed0   :  { %4791 = vmatpush3.bf16.msra.mxu0 %v4788_v56 }
 0xed1   :  { %4793 = vmatprep.subr.bf16.mxu0 %v4792_v58 }
 0xed4   :  { %4795 = vmatpush3.bf16.msra.mxu0 %v4792_v58 }
 0xed5   :  { %4797 = vmatprep.subr.bf16.mxu0 %v4796_v61 }
 0xed8   :  { %4799 = vmatpush3.bf16.msra.mxu0 %v4796_v61 }
 0xed9   :  { %4801 = vmatprep.subr.bf16.mxu0 %v4800_v18 }
 0xedc   :  { %4803 = vmatpush3.bf16.msra.mxu0 %v4800_v18 }
 0xfa2   :  { %v4661_v28 = vpop.f32.mrb[36].mxu0 }
 0xfa3   :  { %v3805_v29 = vadd.f32 %v4661_v28, %v4213_v27  ;;  %v3799_v30 = vpop.f32.mrb[37].mxu0 }
 0xfa4   :  { %v3800_v31 = vadd.f32 %v4213_v27, %v3799_v30 }
 0xfa5   :  { %v3809_v32 = vadd.f32 %v3805_v29, %v5439_v48 }
 0xfa6   :  { %v3808_v33 = vadd.f32 %v3800_v31, %v5437_v47  ;;  %v3857_v47 = vld [vmem:[#allocation7 + $0x20] sm:$0xff] }
 0xfa7   :  { %v3817_v34 = vsel %vm111_vm0, %v3809_v32, 0.0  ;;  %v4780_v49 = vpack.c.bf16 %v3858_v46, %v3857_v47 }
 0xfa8   :  { %3818 = vadd.xlane.f32.xlu1 %v3817_v34  ;;  %v3814_v36 = vsel %vm111_vm0, %v3808_v33, 0.0 }
 0xfa9   :  { %3815 = vadd.xlane.f32.xlu0 %v3814_v36  ;;  %4781 = vmatprep.subr.bf16.mxu1 %v4780_v49 }
 0xfaa   :  { %4783 = vmatpush3.bf16.msra.mxu1 %v4780_v49 }
 0xfab   :  { %4785 = vmatprep.subr.bf16.mxu1 %v4784_v52 }
 0xfae   :  { %4787 = vmatpush3.bf16.msra.mxu1 %v4784_v52 }
0x1035   :  { %v3819_v37 = vpop.xlane.xlu1 %3818 }
0x1036   :  { %v3821_v38 = vmul.f32 0.03125, %v3819_v37  ;;  %v3816_v39 = vpop.xlane.xlu0 %3815 }
0x1037   :  { %v3820_v40 = vmul.f32 0.03125, %v3816_v39 }
0x1038   :  { %v3823_v41 = vsub.f32 %v3809_v32, %v3821_v38 }
0x1039   :  { %v3822_v42 = vsub.f32 %v3808_v33, %v3820_v40 }
0x103a   :  { %v3825_v45 = vmul.f32 %v3823_v41, %v3823_v41 }
0x103b   :  { %v3824_v43 = vmul.f32 %v3822_v42, %v3822_v42 }
0x103c   :  { %v3829_v48 = vsel %vm111_vm0, %v3825_v45, 0.0 }
0x103d   :  { %v3826_v44 = vsel %vm111_vm0, %v3824_v43, 0.0 }
0x103e   :  { %3827 = vadd.xlane.f32.xlu0 %v3826_v44 }
0x1042   :  { %3830 = vadd.xlane.f32.xlu0 %v3829_v48 }
0x10cb   :  { %v3828_v62 = vpop.xlane.xlu0 %3827 }
0x10cc   :  { %v3832_v63 = vmul.f32 0.03125, %v3828_v62 }
0x10ce   :  { %v3834_v0 = vadd.f32 1e-05, %v3832_v63 }
0x10cf   :  { %v3831_v1 = vpop.xlane.xlu0 %3830 }
0x10d0   :  { %4889 = vrsqrt.f32 %v3834_v0  ;;  %v3833_v2 = vmul.f32 0.03125, %v3831_v1 }
0x10d2   :  { %v3835_v3 = vadd.f32 1e-05, %v3833_v2 }
0x10d4   :  { %4891 = vrsqrt.f32 %v3835_v3 }
0x10da   :  { %v4890_v4 = vpop.eup %4889 }
0x10db   :  { %v3838_v6 = vmul.f32 %v4890_v4, %v3822_v42 }
0x10dd   :  { %v3846_v8 = vmul.f32 %v4218_v14, %v3838_v6 }
0x10de   :  { %v4892_v9 = vpop.eup %4891 }
0x10df   :  { %v3839_v10 = vmul.f32 %v4892_v9, %v3823_v41  ;;  %v3854_v11 = vadd.f32 %v4219_v7, %v3846_v8 }
0x10e1   :  { %v3847_v13 = vmul.f32 %v4218_v14, %v3839_v10  ;;  %4670 = vmatprep.mubr.msk.f32.mxu1 %vm111_vm0, %v3854_v11 }
0x10e3   :  { %v3855_v15 = vadd.f32 %v4219_v7, %v3847_v13 }
0x10e5   :  { %4671 = vmatmul.mubr.msk.f32.vlgmr.msra.gmra.mrb[46].mxu1 %vm111_vm0, %v3855_v15 }
0x11b8   :  { %v4672_v12 = vpop.f32.mrb[46].mxu1 }
0x11b9   :  { %v3947_v5 = vadd.f32 %v4672_v12, %v4221_v19  ;;  %v3941_v20 = vpop.f32.mrb[47].mxu1 }
0x11ba   :  { %v3942_v21 = vadd.f32 %v4221_v19, %v3941_v20 }
0x11bb   :  { %v3951_v22 = vmax.f32 %v3947_v5, 0.0 }
0x11bc   :  { %v3950_v35 = vmax.f32 %v3942_v21, 0.0 }
0x11be   :  { %4689 = vmatprep.mubr.msk.f32.mxu0 %vm1966_vm5, %v3950_v35 }
0x11bf   :  { %4690 = vmatmul.mubr.msk.f32.vlgmr.msra.gmra.mrb[38].mxu0 %vm1966_vm5, %v3951_v22 }
0x1292   :  { %v4691_v24 = vpop.f32.mrb[38].mxu0 }
0x1293   :  { %v4047_v25 = vadd.f32 %v4691_v24, %v4233_v23  ;;  %v4041_v26 = vpop.f32.mrb[39].mxu0 }
0x1294   :  { %v4042_v27 = vadd.f32 %v4233_v23, %v4041_v26 }
0x1295   :  { %v4051_v28 = vadd.f32 %v4047_v25, %v3855_v15 }
0x1296   :  { %v4050_v29 = vadd.f32 %v4042_v27, %v3854_v11 }
0x1297   :  { %v4059_v30 = vsel %vm111_vm0, %v4051_v28, 0.0 }
0x1298   :  { %4060 = vadd.xlane.f32.xlu0 %v4059_v30  ;;  %v4056_v31 = vsel %vm111_vm0, %v4050_v29, 0.0 }
0x1299   :  { %4057 = vadd.xlane.f32.xlu1 %v4056_v31 }
0x1325   :  { %v4061_v32 = vpop.xlane.xlu0 %4060 }
0x1326   :  { %v4063_v33 = vmul.f32 0.03125, %v4061_v32  ;;  %v4058_v34 = vpop.xlane.xlu1 %4057 }
0x1327   :  { %v4062_v36 = vmul.f32 0.03125, %v4058_v34 }
0x1328   :  { %v4065_v37 = vsub.f32 %v4051_v28, %v4063_v33 }
0x1329   :  { %v4064_v38 = vsub.f32 %v4050_v29, %v4062_v36 }
0x132a   :  { %v4067_v39 = vmul.f32 %v4065_v37, %v4065_v37 }
0x132b   :  { %v4066_v40 = vmul.f32 %v4064_v38, %v4064_v38 }
0x132c   :  { %v4071_v41 = vsel %vm111_vm0, %v4067_v39, 0.0 }
0x132d   :  { %4072 = vadd.xlane.f32.xlu0 %v4071_v41  ;;  %v4068_v42 = vsel %vm111_vm0, %v4066_v40, 0.0 }
0x132e   :  { %4069 = vadd.xlane.f32.xlu1 %v4068_v42 }
0x13ba   :  { %v4073_v43 = vpop.xlane.xlu0 %4072 }
0x13bb   :  { %v4075_v44 = vmul.f32 0.03125, %v4073_v43  ;;  %v4070_v45 = vpop.xlane.xlu1 %4069 }
0x13bc   :  { %v4074_v48 = vmul.f32 0.03125, %v4070_v45 }
0x13bd   :  { %v4077_v47 = vadd.f32 1e-05, %v4075_v44 }
0x13be   :  { %v4076_v46 = vadd.f32 1e-05, %v4074_v48 }
0x13bf   :  { %4893 = vrsqrt.f32 %v4077_v47 }
0x13c0   :  { %4895 = vrsqrt.f32 %v4076_v46 }
0x13c9   :  { %v4894_v49 = vpop.eup %4893 }
0x13ca   :  { %v4896_v51 = vpop.eup %4895  ;;  %v4081_v52 = vmul.f32 %v4894_v49, %v4065_v37 }
0x13cb   :  { %v4080_v53 = vmul.f32 %v4896_v51, %v4064_v38 }
0x13cc   :  { %v4089_v55 = vmul.f32 %v4238_v50, %v4081_v52 }
0x13cd   :  { %v4088_v56 = vmul.f32 %v4238_v50, %v4080_v53 }
0x13ce   :  { %v4097_v57 = vadd.f32 %v4239_v54, %v4089_v55 }
0x13cf   :  { %v4096_v58 = vadd.f32 %v4239_v54, %v4088_v56 }
0x13d0   :  { %4099 = vst.msk [vmem:[#allocation8 + $0x8] sm:$0xff] %vm111_vm0, %v4097_v57 }
0x13d1   :  { %4098 = vst.msk [vmem:[#allocation8] sm:$0xff] %vm111_vm0, %v4096_v58 }
0x13d2   :  { %4974 = shalt.err (!%p4971_p0)
}
0x13d3   :  { %s4975_s26 = scalar_lea.hbm %s5684_s17, 256 }
0x13d4   :  { %p4976_p1 = scmp.ne.s32.totalorder %s5684_s17, %s4975_s26  ;;  %p4979_p2 = scmp.lt.u32.totalorder %s4975_s26, %s5684_s17 }
0x13d6   :  { %p4981_p3 = pnand %p4979_p2, %p4976_p1 }
0x13d8   :  { %4984 = shalt.err (!%p4981_p3)
}
0x13d9   :  { %s5692_s25 = smov 128  }
0x13da   :  { %4111 = dma.vmem_to_hbm [thread:$0]  %s4106_s27, 256, %s5684_s17, [#allocation4], %s5692_s25, %s5692_s25, %s4994_s22  }
0x13db   :  { %4989 = dma.done.wait [#allocation4], 256  }
0x13dc   :  { %4990 = vsyncadd [#allocation4], 4294967040 }
0x13dd   :  { %4115 = vsyncpa [#allocation3], 1 }
0x13de   :  { %4116 = vsyncpa [#allocation6], 1 }
0x13df   :  { %4117 = vsyncpa [#allocation4], 1 }

</bundles_post_ra>
